<compile_context>
chip_gen: v7x
topology: tpu7x:2x2x1
jax: 0.10.0
libtpu: 0.0.40
codegen_flags: <defaults>
</compile_context>

<pallas_src>
import functools

import jax
import jax.numpy as jnp
from jax.experimental import pallas as pl
from jax.experimental.pallas import tpu as pltpu


def _round_up(x, m):
    return (x + m - 1) // m * m


def gcm_kernel(p1_ref, w1_ref, w2_ref, b2_ref, w3_ref, b3_ref, o_ref, buf,
               *, wp, tail):
    # p1_ref : (1, L, K1)  bf16  flat-padded conv1 im2col (+ ones column)
    # w1_ref : (K1, C1)    bf16  conv1 weights, BN scale folded, last row = BN shift
    # w2_ref : (9, C1, C2) f32   conv2 weights, BN scale folded, tap-major (dy*3+dx)
    # b2_ref : (1, C2)     f32   conv2 folded BN shift
    # w3_ref : (C3P, C2)   f32   conv3 1x1 weights, channel-major, out-ch padded to 8
    # b3_ref : (C3P, 1)    f32   conv3 bias (padded)
    # o_ref  : (1, C3P, L) f32   sigmoid confidences, channel-major, flat-padded
    # buf    : (L+tail,C1) f32   zero-padded conv1 activation (flat row layout)
    L = p1_ref.shape[1]
    C1 = w1_ref.shape[1]

    # ---- conv1 (+ folded BN) as ONE bf16 matmul with f32 accumulation ----
    # The bias/BN-shift enters through the appended ones column, so the
    # padding / alignment rows (all-zero patches) stay exactly 0 after ReLU:
    # this store IS the zero-padded conv2 input -- no border memset needed.
    h1 = jnp.dot(p1_ref[0], w1_ref[...], preferred_element_type=jnp.float32)
    buf[0:L, :] = jnp.maximum(h1, 0.0)
    buf[L:L + tail, :] = jnp.zeros((tail, C1), jnp.float32)

    # ---- conv2: 3x3, pad=1 (+ folded BN scale) ----
    # Each tap is a single CONTIGUOUS row window of the flat buffer
    # (start = dy*(W+2)+dx): no strided slice+reshape copies.  The 9 dots
    # issue back-to-back into one f32 accumulator (MRB-friendly on v7x).
    acc = jnp.dot(buf[0:L, :], w2_ref[0], preferred_element_type=jnp.float32)
    for t in range(1, 9):
        off = (t // 3) * wp + (t % 3)
        acc = acc + jnp.dot(buf[off:off + L, :], w2_ref[t],
                            preferred_element_type=jnp.float32)
    h2 = jnp.maximum(acc + b2_ref[...], 0.0)                      # (L, C2)

    # ---- conv3 (1x1) + bias + sigmoid, emitted channel-major ----
    # Result is produced directly as (8, L): the epilogue (bias add + sigmoid)
    # and the output store run over 8 channel rows, not 128 padded lanes.
    logits = jax.lax.dot_general(w3_ref[...], h2, (((1,), (1,)), ((), ())),
                                 preferred_element_type=jnp.float32)  # (C3P, L)
    o_ref[0] = jax.nn.sigmoid(logits + b3_ref[...])


def _pick_images_per_step(n):
    # Batch a few images per grid step to amortize the ~0.35us fixed step
    # cost, but keep >= 2 grid steps when possible so both v7x TensorCores
    # get work under dimension_semantics=("parallel",).  Capped at 4 to keep
    # the in-kernel live values (h1 / acc spill footprint) modest.
    best = 1
    for b in range(1, min(n, 4) + 1):
        if n % b == 0 and (n // b >= 2 or n == 1):
            best = b
    return best


@jax.jit
def gcm_forward(x_nchw, params):
    """x_nchw: (N, Cin, H, W) float32  ->  (N, 3, H, W) float32."""
    w1, s1, b1, w2, s2, b2, w3, b3 = params
    x = jnp.transpose(x_nchw, (0, 2, 3, 1)).astype(jnp.float32)   # NHWC
    N, H, W, Cin = x.shape
    C1, C2 = w1.shape[3], w2.shape[3]
    C3 = w3.shape[1]
    C3P = 8                                    # 3 real out-channels padded to 8 rows
    K1 = 9 * Cin + 1                           # + ones column carrying the BN shift
    WP = W + 2
    FLAT = _round_up((H + 2) * WP, 16)         # per-image flat-padded row count
    TAIL = _round_up(2 * WP + 2, 8)            # slack so tap windows stay in-bounds
    B = _pick_images_per_step(N)
    G = N // B
    L = B * FLAT

    # --- wrapper-side constant folding / layout prep (free under jit) ---
    w1f = (w1 * s1.reshape(1, 1, 1, C1)).reshape(9 * Cin, C1)
    w1a = jnp.concatenate([w1f, b1.reshape(1, C1)], axis=0).astype(jnp.bfloat16)
    w2f = (w2 * s2.reshape(1, 1, 1, C2)).reshape(9, C1, C2).astype(jnp.float32)
    b2f = b2.reshape(1, C2).astype(jnp.float32)
    w3t = jnp.zeros((C3P, C2), jnp.float32).at[:C3].set(w3.T)     # channel-major
    b3t = jnp.zeros((C3P, 1), jnp.float32).at[:C3, 0].set(b3.reshape(C3))

    # conv1 im2col, tap-major (dy, dx, cin) + ones column, laid out in the
    # flat-padded (H+2)x(W+2) row order so conv2's taps become contiguous row
    # windows inside the kernel.  Border / alignment rows are all-zero patches.
    xp = jnp.pad(x, ((0, 0), (1, 1), (1, 1), (0, 0)))
    taps = [xp[:, dy:dy + H, dx:dx + W, :] for dy in range(3) for dx in range(3)]
    ones = jnp.ones((N, H, W, 1), jnp.float32)
    patches = jnp.concatenate(taps + [ones], axis=-1)             # (N, H, W, K1)
    patches = jnp.pad(patches, ((0, 0), (1, 1), (1, 1), (0, 0)))  # zero borders
    p1 = patches.reshape(N, (H + 2) * WP, K1)
    p1 = jnp.pad(p1, ((0, 0), (0, FLAT - (H + 2) * WP), (0, 0)))  # (N, FLAT, K1)
    p1 = p1.reshape(G, L, K1).astype(jnp.bfloat16)

    kernel = functools.partial(gcm_kernel, wp=WP, tail=TAIL)
    out_cm = pl.pallas_call(
        kernel,
        out_shape=jax.ShapeDtypeStruct((G, C3P, L), jnp.float32),
        grid_spec=pltpu.PrefetchScalarGridSpec(
            num_scalar_prefetch=0,
            grid=(G,),
            in_specs=[
                pl.BlockSpec((1, L, K1), lambda g: (g, 0, 0)),
                pl.BlockSpec((K1, C1), lambda g: (0, 0)),
                pl.BlockSpec((9, C1, C2), lambda g: (0, 0, 0)),
                pl.BlockSpec((1, C2), lambda g: (0, 0)),
                pl.BlockSpec((C3P, C2), lambda g: (0, 0)),
                pl.BlockSpec((C3P, 1), lambda g: (0, 0)),
            ],
            out_specs=pl.BlockSpec((1, C3P, L), lambda g: (g, 0, 0)),
            scratch_shapes=[pltpu.VMEM((L + TAIL, C1), jnp.float32)],
        ),
        compiler_params=pltpu.CompilerParams(
            dimension_semantics=("parallel",)),
    )(p1, w1a, w2f, b2f, w3t, b3t)

    # Un-fold batch from the lane dim and crop the flat padding (layout
    # plumbing only); (N, 3, H, W) falls out directly -- no 128-lane slice.
    out = out_cm.reshape(G, C3P, B, FLAT)
    out = jnp.transpose(out, (0, 2, 1, 3)).reshape(N, C3P, FLAT)
    out = out[:, :C3, :(H + 2) * WP].reshape(N, C3, H + 2, WP)
    return out[:, :, :H, :W]


def make_params(key, cin):
    ks = jax.random.split(key, 12)
    eps = 1e-5

    def bn_fold(kg, kb, km, kv, c):
        gamma = jax.random.uniform(kg, (c,), minval=0.5, maxval=1.5)
        beta = 0.1 * jax.random.normal(kb, (c,))
        mean = 0.1 * jax.random.normal(km, (c,))
        var = jax.random.uniform(kv, (c,), minval=0.5, maxval=1.5)
        s = gamma / jnp.sqrt(var + eps)
        b = beta - mean * s
        return (s.reshape(1, c).astype(jnp.float32),
                b.reshape(1, c).astype(jnp.float32))

    # conv1: OIHW (64, cin, 3, 3) -> HWIO (3, 3, cin, 64)
    w1 = (0.1 * jax.random.normal(ks[0], (64, cin, 3, 3))).astype(jnp.float32)
    w1 = jnp.transpose(w1, (2, 3, 1, 0))
    s1, b1 = bn_fold(ks[1], ks[2], ks[3], ks[4], 64)

    # conv2: OIHW (32, 64, 3, 3) -> HWIO (3, 3, 64, 32)
    w2 = (0.05 * jax.random.normal(ks[5], (32, 64, 3, 3))).astype(jnp.float32)
    w2 = jnp.transpose(w2, (2, 3, 1, 0))
    s2, b2 = bn_fold(ks[6], ks[7], ks[8], ks[9], 32)

    # conv3: 1x1, OIHW (3, 32, 1, 1) -> (32, 3), bias (3,)
    w3 = (0.1 * jax.random.normal(ks[10], (3, 32, 1, 1))).astype(jnp.float32)
    w3 = jnp.transpose(w3[:, :, 0, 0], (1, 0))
    b3 = (0.1 * jax.random.normal(ks[11], (3,))).astype(jnp.float32).reshape(1, 3)

    return (w1, s1, b1, w2, s2, b2, w3, b3)


def reference(x_nchw, params):
    """Pure-JAX f32 reference (NHWC convs) for numerical sanity checking."""
    w1, s1, b1, w2, s2, b2, w3, b3 = params
    dn = ('NHWC', 'HWIO', 'NHWC')
    hp = jax.lax.Precision.HIGHEST
    x = jnp.transpose(x_nchw, (0, 2, 3, 1)).astype(jnp.float32)
    h = jax.lax.conv_general_dilated(x, w1, (1, 1), 'SAME',
                                     dimension_numbers=dn, precision=hp)
    h = jnp.maximum(h * s1.reshape(1, 1, 1, -1) + b1.reshape(1, 1, 1, -1), 0.0)
    h = jax.lax.conv_general_dilated(h, w2, (1, 1), 'SAME',
                                     dimension_numbers=dn, precision=hp)
    h = jnp.maximum(h * s2.reshape(1, 1, 1, -1) + b2.reshape(1, 1, 1, -1), 0.0)
    h = jnp.einsum('nhwc,cd->nhwd', h, w3, precision=hp) + b3.reshape(1, 1, 1, -1)
    h = jax.nn.sigmoid(h)
    return jnp.transpose(h, (0, 3, 1, 2))


if __name__ == "__main__":
    N, Cin, H, W = 2, 4, 16, 16
    key = jax.random.PRNGKey(0)
    k_x, k_p = jax.random.split(key)

    x = jax.random.normal(k_x, (N, Cin, H, W), dtype=jnp.float32)
    params = make_params(k_p, Cin)

    out = gcm_forward(x, params)
    out = jax.block_until_ready(out)

    assert out.shape == (N, 3, H, W), out.shape
    ref = reference(x, params)
    err = float(jnp.max(jnp.abs(out - ref)))
    # bf16 MXU operands on conv1 (f32 accumulation) -> keep a small margin.
    assert jnp.allclose(out, ref, atol=3e-3, rtol=1e-3), err

    print("KERNEL_OK")
</pallas_src>

<mosaic_0001>
module attributes {stable_mosaic.version = 11 : i64} {
  func.func @gcm_kernel(%arg0: i32, %arg1: memref<1x336x37xbf16, #tpu.memory_space<vmem>>, %arg2: memref<37x64xbf16, #tpu.memory_space<vmem>>, %arg3: memref<9x64x32xf32, #tpu.memory_space<vmem>>, %arg4: memref<1x32xf32, #tpu.memory_space<vmem>>, %arg5: memref<8x32xf32, #tpu.memory_space<vmem>>, %arg6: memref<8x1xf32, #tpu.memory_space<vmem>>, %arg7: memref<1x8x336xf32, #tpu.memory_space<vmem>>, %arg8: memref<376x64xf32, #tpu.memory_space<vmem>>) attributes {dimension_semantics = [#tpu.dimension_semantics<parallel>], iteration_bounds = array<i64: 2>, scalar_prefetch = 0 : i64, scratch_operands = 1 : i64, tpu.core_type = #tpu.core_type<tc>, window_params = [{transform_indices = @transform_0, window_bounds = array<i64: 1, 336, 37>}, {pipeline_mode = #tpu.pipeline_mode<synchronous>, transform_indices = @transform_1, window_bounds = array<i64: 37, 64>}, {pipeline_mode = #tpu.pipeline_mode<synchronous>, transform_indices = @transform_2, window_bounds = array<i64: 9, 64, 32>}, {pipeline_mode = #tpu.pipeline_mode<synchronous>, transform_indices = @transform_3, window_bounds = array<i64: 1, 32>}, {pipeline_mode = #tpu.pipeline_mode<synchronous>, transform_indices = @transform_4, window_bounds = array<i64: 8, 32>}, {pipeline_mode = #tpu.pipeline_mode<synchronous>, transform_indices = @transform_5, window_bounds = array<i64: 8, 1>}, {transform_indices = @transform_6, window_bounds = array<i64: 1, 8, 336>}]} {
    %c0 = arith.constant 0 : index
    %c0_0 = arith.constant 0 : index
    %c0_1 = arith.constant 0 : index
    %0 = vector.load %arg1[%c0, %c0_0, %c0_1] : memref<1x336x37xbf16, #tpu.memory_space<vmem>>, vector<1x336x37xbf16>
    %1 = vector.shape_cast %0 : vector<1x336x37xbf16> to vector<336x37xbf16>
    %c0_2 = arith.constant 0 : index
    %c0_3 = arith.constant 0 : index
    %2 = vector.load %arg2[%c0_2, %c0_3] : memref<37x64xbf16, #tpu.memory_space<vmem>>, vector<37x64xbf16>
    %cst = arith.constant dense<0.000000e+00> : vector<336x64xf32>
    %3 = tpu.matmul %1, %2, %cst {dimension_numbers = #tpu.dot_dimension_numbers<[1], [0], [0], [1], [0, 0, 1, 1], [], []>} : vector<336x37xbf16>, vector<37x64xbf16>, vector<336x64xf32> -> vector<336x64xf32>
    %cst_4 = arith.constant 0.000000e+00 : f32
    %4 = vector.broadcast %cst_4 : f32 to vector<336x64xf32>
    %5 = arith.maximumf %3, %4 : vector<336x64xf32>
    %c0_5 = arith.constant 0 : index
    %c0_6 = arith.constant 0 : index
    %6 = vector.load %arg8[%c0_5, %c0_6] : memref<376x64xf32, #tpu.memory_space<vmem>>, vector<336x64xf32>
    tpu.vector_store %arg8[%c0_5, %c0_6], %5 {strides = array<i32>} : memref<376x64xf32, #tpu.memory_space<vmem>>, vector<336x64xf32>,
    %cst_7 = arith.constant 0.000000e+00 : f32
    %7 = vector.broadcast %cst_7 : f32 to vector<40x64xf32>
    %c336 = arith.constant 336 : index
    %c0_8 = arith.constant 0 : index
    %8 = vector.load %arg8[%c336, %c0_8] : memref<376x64xf32, #tpu.memory_space<vmem>>, vector<40x64xf32>
    tpu.vector_store %arg8[%c336, %c0_8], %7 {strides = array<i32>} : memref<376x64xf32, #tpu.memory_space<vmem>>, vector<40x64xf32>,
    %c0_9 = arith.constant 0 : index
    %c0_10 = arith.constant 0 : index
    %9 = vector.load %arg8[%c0_9, %c0_10] : memref<376x64xf32, #tpu.memory_space<vmem>>, vector<336x64xf32>
    %c0_11 = arith.constant 0 : index
    %c0_12 = arith.constant 0 : index
    %c0_13 = arith.constant 0 : index
    %10 = vector.load %arg3[%c0_11, %c0_12, %c0_13] : memref<9x64x32xf32, #tpu.memory_space<vmem>>, vector<1x64x32xf32>
    %11 = vector.shape_cast %10 : vector<1x64x32xf32> to vector<64x32xf32>
    %cst_14 = arith.constant dense<0.000000e+00> : vector<336x32xf32>
    %12 = tpu.matmul %9, %11, %cst_14 {dimension_numbers = #tpu.dot_dimension_numbers<[1], [0], [0], [1], [0, 0, 1, 1], [], []>} : vector<336x64xf32>, vector<64x32xf32>, vector<336x32xf32> -> vector<336x32xf32>
    %c1 = arith.constant 1 : index
    %c0_15 = arith.constant 0 : index
    %13 = vector.load %arg8[%c1, %c0_15] : memref<376x64xf32, #tpu.memory_space<vmem>>, vector<336x64xf32>
    %c1_16 = arith.constant 1 : index
    %c0_17 = arith.constant 0 : index
    %c0_18 = arith.constant 0 : index
    %14 = vector.load %arg3[%c1_16, %c0_17, %c0_18] : memref<9x64x32xf32, #tpu.memory_space<vmem>>, vector<1x64x32xf32>
    %15 = vector.shape_cast %14 : vector<1x64x32xf32> to vector<64x32xf32>
    %cst_19 = arith.constant dense<0.000000e+00> : vector<336x32xf32>
    %16 = tpu.matmul %13, %15, %cst_19 {dimension_numbers = #tpu.dot_dimension_numbers<[1], [0], [0], [1], [0, 0, 1, 1], [], []>} : vector<336x64xf32>, vector<64x32xf32>, vector<336x32xf32> -> vector<336x32xf32>
    %17 = arith.addf %12, %16 : vector<336x32xf32>
    %c2 = arith.constant 2 : index
    %c0_20 = arith.constant 0 : index
    %18 = vector.load %arg8[%c2, %c0_20] : memref<376x64xf32, #tpu.memory_space<vmem>>, vector<336x64xf32>
    %c2_21 = arith.constant 2 : index
    %c0_22 = arith.constant 0 : index
    %c0_23 = arith.constant 0 : index
    %19 = vector.load %arg3[%c2_21, %c0_22, %c0_23] : memref<9x64x32xf32, #tpu.memory_space<vmem>>, vector<1x64x32xf32>
    %20 = vector.shape_cast %19 : vector<1x64x32xf32> to vector<64x32xf32>
    %cst_24 = arith.constant dense<0.000000e+00> : vector<336x32xf32>
    %21 = tpu.matmul %18, %20, %cst_24 {dimension_numbers = #tpu.dot_dimension_numbers<[1], [0], [0], [1], [0, 0, 1, 1], [], []>} : vector<336x64xf32>, vector<64x32xf32>, vector<336x32xf32> -> vector<336x32xf32>
    %22 = arith.addf %17, %21 : vector<336x32xf32>
    %c18 = arith.constant 18 : index
    %c0_25 = arith.constant 0 : index
    %23 = vector.load %arg8[%c18, %c0_25] : memref<376x64xf32, #tpu.memory_space<vmem>>, vector<336x64xf32>
    %c3 = arith.constant 3 : index
    %c0_26 = arith.constant 0 : index
    %c0_27 = arith.constant 0 : index
    %24 = vector.load %arg3[%c3, %c0_26, %c0_27] : memref<9x64x32xf32, #tpu.memory_space<vmem>>, vector<1x64x32xf32>
    %25 = vector.shape_cast %24 : vector<1x64x32xf32> to vector<64x32xf32>
    %cst_28 = arith.constant dense<0.000000e+00> : vector<336x32xf32>
    %26 = tpu.matmul %23, %25, %cst_28 {dimension_numbers = #tpu.dot_dimension_numbers<[1], [0], [0], [1], [0, 0, 1, 1], [], []>} : vector<336x64xf32>, vector<64x32xf32>, vector<336x32xf32> -> vector<336x32xf32>
    %27 = arith.addf %22, %26 : vector<336x32xf32>
    %c19 = arith.constant 19 : index
    %c0_29 = arith.constant 0 : index
    %28 = vector.load %arg8[%c19, %c0_29] : memref<376x64xf32, #tpu.memory_space<vmem>>, vector<336x64xf32>
    %c4 = arith.constant 4 : index
    %c0_30 = arith.constant 0 : index
    %c0_31 = arith.constant 0 : index
    %29 = vector.load %arg3[%c4, %c0_30, %c0_31] : memref<9x64x32xf32, #tpu.memory_space<vmem>>, vector<1x64x32xf32>
    %30 = vector.shape_cast %29 : vector<1x64x32xf32> to vector<64x32xf32>
    %cst_32 = arith.constant dense<0.000000e+00> : vector<336x32xf32>
    %31 = tpu.matmul %28, %30, %cst_32 {dimension_numbers = #tpu.dot_dimension_numbers<[1], [0], [0], [1], [0, 0, 1, 1], [], []>} : vector<336x64xf32>, vector<64x32xf32>, vector<336x32xf32> -> vector<336x32xf32>
    %32 = arith.addf %27, %31 : vector<336x32xf32>
    %c20 = arith.constant 20 : index
    %c0_33 = arith.constant 0 : index
    %33 = vector.load %arg8[%c20, %c0_33] : memref<376x64xf32, #tpu.memory_space<vmem>>, vector<336x64xf32>
    %c5 = arith.constant 5 : index
    %c0_34 = arith.constant 0 : index
    %c0_35 = arith.constant 0 : index
    %34 = vector.load %arg3[%c5, %c0_34, %c0_35] : memref<9x64x32xf32, #tpu.memory_space<vmem>>, vector<1x64x32xf32>
    %35 = vector.shape_cast %34 : vector<1x64x32xf32> to vector<64x32xf32>
    %cst_36 = arith.constant dense<0.000000e+00> : vector<336x32xf32>
    %36 = tpu.matmul %33, %35, %cst_36 {dimension_numbers = #tpu.dot_dimension_numbers<[1], [0], [0], [1], [0, 0, 1, 1], [], []>} : vector<336x64xf32>, vector<64x32xf32>, vector<336x32xf32> -> vector<336x32xf32>
    %37 = arith.addf %32, %36 : vector<336x32xf32>
    %c36 = arith.constant 36 : index
    %c0_37 = arith.constant 0 : index
    %38 = vector.load %arg8[%c36, %c0_37] : memref<376x64xf32, #tpu.memory_space<vmem>>, vector<336x64xf32>
    %c6 = arith.constant 6 : index
    %c0_38 = arith.constant 0 : index
    %c0_39 = arith.constant 0 : index
    %39 = vector.load %arg3[%c6, %c0_38, %c0_39] : memref<9x64x32xf32, #tpu.memory_space<vmem>>, vector<1x64x32xf32>
    %40 = vector.shape_cast %39 : vector<1x64x32xf32> to vector<64x32xf32>
    %cst_40 = arith.constant dense<0.000000e+00> : vector<336x32xf32>
    %41 = tpu.matmul %38, %40, %cst_40 {dimension_numbers = #tpu.dot_dimension_numbers<[1], [0], [0], [1], [0, 0, 1, 1], [], []>} : vector<336x64xf32>, vector<64x32xf32>, vector<336x32xf32> -> vector<336x32xf32>
    %42 = arith.addf %37, %41 : vector<336x32xf32>
    %c37 = arith.constant 37 : index
    %c0_41 = arith.constant 0 : index
    %43 = vector.load %arg8[%c37, %c0_41] : memref<376x64xf32, #tpu.memory_space<vmem>>, vector<336x64xf32>
    %c7 = arith.constant 7 : index
    %c0_42 = arith.constant 0 : index
    %c0_43 = arith.constant 0 : index
    %44 = vector.load %arg3[%c7, %c0_42, %c0_43] : memref<9x64x32xf32, #tpu.memory_space<vmem>>, vector<1x64x32xf32>
    %45 = vector.shape_cast %44 : vector<1x64x32xf32> to vector<64x32xf32>
    %cst_44 = arith.constant dense<0.000000e+00> : vector<336x32xf32>
    %46 = tpu.matmul %43, %45, %cst_44 {dimension_numbers = #tpu.dot_dimension_numbers<[1], [0], [0], [1], [0, 0, 1, 1], [], []>} : vector<336x64xf32>, vector<64x32xf32>, vector<336x32xf32> -> vector<336x32xf32>
    %47 = arith.addf %42, %46 : vector<336x32xf32>
    %c38 = arith.constant 38 : index
    %c0_45 = arith.constant 0 : index
    %48 = vector.load %arg8[%c38, %c0_45] : memref<376x64xf32, #tpu.memory_space<vmem>>, vector<336x64xf32>
    %c8 = arith.constant 8 : index
    %c0_46 = arith.constant 0 : index
    %c0_47 = arith.constant 0 : index
    %49 = vector.load %arg3[%c8, %c0_46, %c0_47] : memref<9x64x32xf32, #tpu.memory_space<vmem>>, vector<1x64x32xf32>
    %50 = vector.shape_cast %49 : vector<1x64x32xf32> to vector<64x32xf32>
    %cst_48 = arith.constant dense<0.000000e+00> : vector<336x32xf32>
    %51 = tpu.matmul %48, %50, %cst_48 {dimension_numbers = #tpu.dot_dimension_numbers<[1], [0], [0], [1], [0, 0, 1, 1], [], []>} : vector<336x64xf32>, vector<64x32xf32>, vector<336x32xf32> -> vector<336x32xf32>
    %52 = arith.addf %47, %51 : vector<336x32xf32>
    %c0_49 = arith.constant 0 : index
    %c0_50 = arith.constant 0 : index
    %53 = vector.load %arg4[%c0_49, %c0_50] : memref<1x32xf32, #tpu.memory_space<vmem>>, vector<1x32xf32>
    %54 = vector.broadcast %53 : vector<1x32xf32> to vector<336x32xf32>
    %55 = arith.addf %52, %54 : vector<336x32xf32>
    %cst_51 = arith.constant 0.000000e+00 : f32
    %56 = vector.broadcast %cst_51 : f32 to vector<336x32xf32>
    %57 = arith.maximumf %55, %56 : vector<336x32xf32>
    %c0_52 = arith.constant 0 : index
    %c0_53 = arith.constant 0 : index
    %58 = vector.load %arg5[%c0_52, %c0_53] : memref<8x32xf32, #tpu.memory_space<vmem>>, vector<8x32xf32>
    %cst_54 = arith.constant dense<0.000000e+00> : vector<8x336xf32>
    %59 = tpu.matmul %58, %57, %cst_54 {dimension_numbers = #tpu.dot_dimension_numbers<[1], [1], [0], [0], [0, 0, 1, 0], [], []>} : vector<8x32xf32>, vector<336x32xf32>, vector<8x336xf32> -> vector<8x336xf32>
    %c0_55 = arith.constant 0 : index
    %c0_56 = arith.constant 0 : index
    %60 = vector.load %arg6[%c0_55, %c0_56] : memref<8x1xf32, #tpu.memory_space<vmem>>, vector<8x1xf32>
    %61 = vector.broadcast %60 : vector<8x1xf32> to vector<8x336xf32>
    %62 = arith.addf %59, %61 : vector<8x336xf32>
    %63 = arith.negf %62 : vector<8x336xf32>
    %64 = math.exp %63 : vector<8x336xf32>
    %cst_57 = arith.constant 1.000000e+00 : f32
    %65 = vector.broadcast %cst_57 : f32 to vector<8x336xf32>
    %66 = arith.addf %65, %64 : vector<8x336xf32>
    %67 = arith.divf %65, %66 : vector<8x336xf32>
    %c0_58 = arith.constant 0 : index
    %c0_59 = arith.constant 0 : index
    %c0_60 = arith.constant 0 : index
    %68 = vector.load %arg7[%c0_58, %c0_59, %c0_60] : memref<1x8x336xf32, #tpu.memory_space<vmem>>, vector<1x8x336xf32>
    %69 = vector.shape_cast %68 : vector<1x8x336xf32> to vector<8x336xf32>
    %70 = vector.shape_cast %67 : vector<8x336xf32> to vector<1x8x336xf32>
    tpu.vector_store %arg7[%c0_58, %c0_59, %c0_60], %70 {strides = array<i32>} : memref<1x8x336xf32, #tpu.memory_space<vmem>>, vector<1x8x336xf32>,
    return
  }
  func.func @transform_0(%arg0: i32) -> (i32, i32, i32) {
    %c0_i32 = arith.constant 0 : i32
    %c0_i32_0 = arith.constant 0 : i32
    %c0_i32_1 = arith.constant 0 : i32
    return %arg0, %c0_i32, %c0_i32_0 : i32, i32, i32
  }
  func.func @transform_1(%arg0: i32) -> (i32, i32) {
    %c0_i32 = arith.constant 0 : i32
    %c0_i32_0 = arith.constant 0 : i32
    %c0_i32_1 = arith.constant 0 : i32
    return %c0_i32, %c0_i32_0 : i32, i32
  }
  func.func @transform_2(%arg0: i32) -> (i32, i32, i32) {
    %c0_i32 = arith.constant 0 : i32
    %c0_i32_0 = arith.constant 0 : i32
    %c0_i32_1 = arith.constant 0 : i32
    %c0_i32_2 = arith.constant 0 : i32
    return %c0_i32, %c0_i32_0, %c0_i32_1 : i32, i32, i32
  }
  func.func @transform_3(%arg0: i32) -> (i32, i32) {
    %c0_i32 = arith.constant 0 : i32
    %c0_i32_0 = arith.constant 0 : i32
    %c0_i32_1 = arith.constant 0 : i32
    return %c0_i32, %c0_i32_0 : i32, i32
  }
  func.func @transform_4(%arg0: i32) -> (i32, i32) {
    %c0_i32 = arith.constant 0 : i32
    %c0_i32_0 = arith.constant 0 : i32
    %c0_i32_1 = arith.constant 0 : i32
    return %c0_i32, %c0_i32_0 : i32, i32
  }
  func.func @transform_5(%arg0: i32) -> (i32, i32) {
    %c0_i32 = arith.constant 0 : i32
    %c0_i32_0 = arith.constant 0 : i32
    %c0_i32_1 = arith.constant 0 : i32
    return %c0_i32, %c0_i32_0 : i32, i32
  }
  func.func @transform_6(%arg0: i32) -> (i32, i32, i32) {
    %c0_i32 = arith.constant 0 : i32
    %c0_i32_0 = arith.constant 0 : i32
    %c0_i32_1 = arith.constant 0 : i32
    return %arg0, %c0_i32, %c0_i32_0 : i32, i32, i32
  }
}

</mosaic_0001>

<bundles_post_ra>
// kernel: gcm_forward.1
= control target key start
LH: loop header
LB: loop body
LE: loop exit
PB: predicated region body
PF: predicated region fallthrough
CT: control target
= control target key end

     0   :  { %s8124_s21 = smov 0   ;;  %s9430_s0 = inlined_call_operand.vmem [shape: bf16[2,336,37], index: 0, kind: input, shape index: {}]   ;;  %s9431_s1 = inlined_call_operand.vmem [shape: bf16[37,64], index: 1, kind: input, shape index: {}]   ;;  %s9432_s2 = inlined_call_operand.vmem [shape: f32[9,64,32], index: 2, kind: input, shape index: {}]   ;;  %s9433_s3 = inlined_call_operand.vmem [shape: f32[1,32], index: 3, kind: input, shape index: {}]   ;;  %s9434_s4 = inlined_call_operand.vmem [shape: f32[8,32], index: 4, kind: input, shape index: {}]   ;;  %s9435_s5 = inlined_call_operand.vmem [shape: f32[8,1], index: 5, kind: input, shape index: {}]   ;;  %s9436_s6 = inlined_call_operand.vmem [shape: f32[2,8,336], index: 6, kind: output, shape index: {}]  }
   0x1 LB: > { %s5589_s22 = sadd.s32 4294967295, %s8082_s21   ;;  %p5593_p0 = scmp.ge.s32.totalorder %s8082_s21, 1  ;;  %s8082_s21 = sphi %s8124_s21, %s16_s21  }
   0x2   : > { %p212_p1 = scmp.lt.s32.totalorder %s8082_s21, 3 }
   0x4   : > { %p213_p2 = pnand %p5593_p0, %p212_p1 }
   0x5   : > { %v8040_v0 = vld [vmem:[%s9431_s1] sm:$0xff] (!%p213_p2)   ;;  %v8084_v1 = vmov (!%p213_p2), 0.0   ;;  %v8041_v2 = vld [vmem:[%s9431_s1 + $0x8] sm:$0xff] (!%p213_p2)   ;;  %vm484_vm0 = vcmask (!%p213_p2), 1041408   ;;  %vm485_vm1 = vcmask (!%p213_p2), 1042432   ;;  %p242_p3 = scmp.lt.s32.totalorder (!%p213_p2), %s5589_s22, 1 }
   0x6   : > { %216 = sbr.rel (%p213_p2) target bundleno = 1347 (0x543), region = 44  ;;  %6652 = vmatprep.subr.bf16.mxu0 (!%p213_p2), %v8084_v1  ;;  %v8042_v3 = vld [vmem:[%s9431_s1 + $0x10] ss:$0 sps:$4 sm:$0x77] (!%p213_p2)   ;;  %v8085_v4 = vmov (!%p213_p2), 65535   ;;  %vm8086_vm2 = vmmov (!%p213_p2), 0  }
   0x7   : > { %6653 = vmatpush3.bf16.msra.mxu0 (!%p213_p2), %v8040_v0  ;;  %v486_v5 = vsel (!%p213_p2), %vm484_vm0, 4294967295, %v8085_v4  ;;  %6658 = vmatprep.mubr.msk.bf16.mxu0 (!%p213_p2), %vm8086_vm2, %v8084_v1  ;;  %vm420_vm3 = vcmask (!%p213_p2), 302080   ;;  %v5641_v19 = vld [vmem:[%s9432_s2 + $0x40] sm:$0xff] (!%p213_p2)  ;;  %v5642_v20 = vld [vmem:[%s9432_s2 + $0x48] sm:$0xff] (!%p213_p2)  ;;  %vm734_vm4 = vcmask (!%p213_p2), 523264   ;;  %v5643_v23 = vld [vmem:[%s9432_s2 + $0x50] sm:$0xff] (!%p213_p2) }
   0x8   : > { %6654 = vmatprep.subr.bf16.mxu0 (!%p213_p2), %v8084_v1  ;;  %v487_v6 = vsel (!%p213_p2), %vm485_vm1, %v486_v5, 0  ;;  %v7476_v22 = vpack.c.bf16 (!%p213_p2), %v5642_v20, %v5641_v19  ;;  %777 = vst.msk [vmem:[#allocation2 + $0x150] sm:$0xff] (!%p213_p2), %vm734_vm4, %v8084_v1  ;;  %778 = vst.msk [vmem:[#allocation2 + $0x158] sm:$0xff] (!%p213_p2), %vm734_vm4, %v8084_v1  ;;  %v5644_v24 = vld [vmem:[%s9432_s2 + $0x58] sm:$0xff] (!%p213_p2)  ;;  %v5645_v26 = vld [vmem:[%s9432_s2 + $0x60] sm:$0xff] (!%p213_p2)  ;;  %vm5241_vm5 = vcmask (!%p213_p2), 261120  }
   0x9   : > { %v489_v7 = vand.u32 (!%p213_p2), %v8042_v3, %v487_v6  ;;  %779 = vst.msk [vmem:[#allocation2 + $0x160] sm:$0xff] (!%p213_p2), %vm734_vm4, %v8084_v1  ;;  %780 = vst.msk [vmem:[#allocation2 + $0x168] sm:$0xff] (!%p213_p2), %vm734_vm4, %v8084_v1  ;;  %v7480_v25 = vpack.c.bf16 (!%p213_p2), %v5644_v24, %v5643_v23  ;;  %v5646_v27 = vld [vmem:[%s9432_s2 + $0x68] sm:$0xff] (!%p213_p2)  ;;  %v5783_v28 = vld [vmem:[%s9432_s2 + $0xc0] sm:$0xff] (!%p213_p2)  ;;  %vm5532_vm7 = vcmask (!%p213_p2), 654336  }
   0xa   : > { %781 = vst.msk [vmem:[#allocation2 + $0x170] sm:$0xff] (!%p213_p2), %vm734_vm4, %v8084_v1  ;;  %v7484_v30 = vpack.c.bf16 (!%p213_p2), %v5646_v27, %v5645_v26  ;;  %v5784_v31 = vld [vmem:[%s9432_s2 + $0xc8] sm:$0xff] (!%p213_p2)  ;;  %v5647_v33 = vld [vmem:[%s9432_s2 + $0x70] sm:$0xff] (!%p213_p2)  ;;  %v5648_v34 = vld [vmem:[%s9432_s2 + $0x78] sm:$0xff] (!%p213_p2) }
   0xb   : > { %6655 = vmatpush3.bf16.msra.mxu0 (!%p213_p2), %v8041_v2  ;;  %v7524_v32 = vpack.c.bf16 (!%p213_p2), %v5784_v31, %v5783_v28  ;;  %v5785_v35 = vld [vmem:[%s9432_s2 + $0xd0] sm:$0xff] (!%p213_p2)  ;;  %v7488_v36 = vpack.c.bf16 (!%p213_p2), %v5648_v34, %v5647_v33  ;;  %v5786_v37 = vld [vmem:[%s9432_s2 + $0xd8] sm:$0xff] (!%p213_p2)  ;;  %v5787_v39 = vld [vmem:[%s9432_s2 + $0xe0] sm:$0xff] (!%p213_p2) }
   0xc   : > { %6656 = vmatprep.subr.bf16.mxu0 (!%p213_p2), %v8084_v1  ;;  %v7528_v38 = vpack.c.bf16 (!%p213_p2), %v5786_v37, %v5785_v35  ;;  %v5788_v40 = vld [vmem:[%s9432_s2 + $0xe8] sm:$0xff] (!%p213_p2)  ;;  %v5789_v43 = vld [vmem:[%s9432_s2 + $0xf0] sm:$0xff] (!%p213_p2)  ;;  %v5790_v44 = vld [vmem:[%s9432_s2 + $0xf8] sm:$0xff] (!%p213_p2) }
   0xd   : > { %s9440_s22 = smov (!%p242_p3, %s5589_s22), 1  ;;  %7525 = vmatprep.subr.bf16.mxu1 %v7524_v32  ;;  %v7532_v42 = vpack.c.bf16 %v5788_v40, %v5787_v39  ;;  %v7536_v45 = vpack.c.bf16 %v5790_v44, %v5789_v43  ;;  %v5833_v53 = vld [vmem:[%s9432_s2 + $0x100] sm:$0xff]  ;;  %v5834_v54 = vld [vmem:[%s9432_s2 + $0x108] sm:$0xff]  ;;  %v826_v44 = vld [vmem:[%s9432_s2 + $0x10] sm:$0xff] }
   0xe   : > { %s8024_s29 = smul.u32 168, %s9440_s22  ;;  %7527 = vmatpush3.bf16.msra.mxu1 %v7524_v32  ;;  %v7540_v55 = vpack.c.bf16 %v5834_v54, %v5833_v53  ;;  %v5837_v39 = vld [vmem:[%s9432_s2 + $0x120] sm:$0xff]  ;;  %v5838_v40 = vld [vmem:[%s9432_s2 + $0x128] sm:$0xff]  ;;  %vm9318_vm6 = vmpackc.low %vm5241_vm5, %vm5241_vm5 }
   0xf   : > { %6657 = vmatpush3.bf16.msra.mxu0 %v489_v7  ;;  %7529 = vmatprep.subr.bf16.mxu1 %v7528_v38  ;;  %v7548_v43 = vpack.c.bf16 %v5838_v40, %v5837_v39 }
  0x10   : > { %s8152_s8 = scalar_lea.vmem %s9430_s0, %s8024_s29  ;;  %7477 = vmatprep.subr.bf16.mxu0 %v7476_v22  ;;  %s8025_s29 = smul.u32 24, %s9440_s22 }
  0x11   : > { %v8043_v8 = vld [vmem:[%s8152_s8] sm:$0xff]   ;;  %v8044_v9 = vld [vmem:[%s8152_s8 + $0x8] sm:$0xff]   ;;  %v8045_v10 = vld [vmem:[%s8152_s8 + $0x10] sm:$0xff]  }
  0x12   : > { %6659 = vmatmul.mubr.msk.bf16.vlgmr.msra.gmra.mrb[0].mxu0 %vm420_vm3, %v8043_v8  ;;  %v8046_v11 = vld [vmem:[%s8152_s8 + $0x18] sm:$0xff]   ;;  %v8047_v12 = vld [vmem:[%s8152_s8 + $0x20] sm:$0xff]   ;;  %v8048_v13 = vld [vmem:[%s8152_s8 + $0x28] sm:$0xff]   ;;  %7531 = vmatpush3.bf16.msra.mxu1 %v7528_v38  ;;  %s251_s9 = scalar_lea.vmem %s9436_s6, %s8025_s29 }
  0x13   : > { %6662 = vmatprep.mubr.msk.bf16.mxu0 %vm8086_vm2, %v8084_v1  ;;  %v8049_v14 = vld [vmem:[%s8152_s8 + $0x30] sm:$0xff]   ;;  %v8050_v15 = vld [vmem:[%s8152_s8 + $0x38] sm:$0xff]   ;;  %v8051_v16 = vld [vmem:[%s8152_s8 + $0x40] sm:$0xff]   ;;  %7479 = vmatpush3.bf16.msra.mxu0 %v7476_v22 }
  0x14   : > { %v8052_v17 = vld [vmem:[%s8152_s8 + $0x48] sm:$0xff]   ;;  %v8053_v18 = vld [vmem:[%s8152_s8 + $0x50] sm:$0xff]   ;;  %v8054_v21 = vld [vmem:[%s8152_s8 + $0x58] sm:$0xff]   ;;  %7481 = vmatprep.subr.bf16.mxu0 %v7480_v25  ;;  %7533 = vmatprep.subr.bf16.mxu1 %v7532_v42 }
  0x15   : > { %v8055_v29 = vld [vmem:[%s8152_s8 + $0x60] sm:$0xff]   ;;  %v8056_v41 = vld [vmem:[%s8152_s8 + $0x68] sm:$0xff]   ;;  %v8057_v46 = vld [vmem:[%s8152_s8 + $0x70] sm:$0xff]  }
  0x16   : > { %7535 = vmatpush3.bf16.msra.mxu1 %v7532_v42  ;;  %v8058_v47 = vld [vmem:[%s8152_s8 + $0x78] sm:$0xff]   ;;  %v8059_v48 = vld [vmem:[%s8152_s8 + $0x80] sm:$0xff]   ;;  %v8060_v49 = vld [vmem:[%s8152_s8 + $0x88] sm:$0xff]  }
  0x17   : > { %7483 = vmatpush3.bf16.msra.mxu0 %v7480_v25  ;;  %7537 = vmatprep.subr.bf16.mxu1 %v7536_v45  ;;  %v8061_v50 = vld [vmem:[%s8152_s8 + $0x90] sm:$0xff]   ;;  %v8062_v51 = vld [vmem:[%s8152_s8 + $0x98] sm:$0xff]   ;;  %v8063_v52 = vld [vmem:[%s8152_s8 + $0xa0] sm:$0xff]  }
  0x18   : > { %7485 = vmatprep.subr.bf16.mxu0 %v7484_v30 }
  0x1a   : > { %6663 = vmatmul.mubr.msk.bf16.gmra.mrb[4].mxu0 %vm420_vm3, %v8044_v9  ;;  %7539 = vmatpush3.bf16.msra.mxu1 %v7536_v45  ;;  %v827_v45 = vld [vmem:[%s9432_s2 + $0x18] sm:$0xff] }
  0x1b   : > { %6666 = vmatprep.mubr.msk.bf16.mxu0 %vm8086_vm2, %v8084_v1  ;;  %7487 = vmatpush3.bf16.msra.mxu0 %v7484_v30  ;;  %v825_v30 = vld [vmem:[%s9432_s2 + $0x8] sm:$0xff] }
  0x1c   : > { %7489 = vmatprep.subr.bf16.mxu0 %v7488_v36  ;;  %7541 = vmatprep.subr.bf16.mxu1 %v7540_v55 }
  0x1f   : > { %7491 = vmatpush3.bf16.msra.mxu0 %v7488_v36 }
  0x22   : > { %6667 = vmatmul.mubr.msk.bf16.gmra.mrb[8].mxu0 %vm420_vm3, %v8045_v10 }
  0x23   : > { %6670 = vmatprep.mubr.msk.bf16.mxu0 %vm8086_vm2, %v8084_v1 }
  0x2a   : > { %6671 = vmatmul.mubr.msk.bf16.gmra.mrb[12].mxu0 %vm420_vm3, %v8046_v11 }
  0x2b   : > { %6674 = vmatprep.mubr.msk.bf16.mxu0 %vm8086_vm2, %v8084_v1 }
  0x32   : > { %6675 = vmatmul.mubr.msk.bf16.gmra.mrb[16].mxu0 %vm420_vm3, %v8047_v12 }
  0x33   : > { %6678 = vmatprep.mubr.msk.bf16.mxu0 %vm8086_vm2, %v8084_v1 }
  0x3a   : > { %6679 = vmatmul.mubr.msk.bf16.gmra.mrb[20].mxu0 %vm420_vm3, %v8048_v13 }
  0x3b   : > { %6682 = vmatprep.mubr.msk.bf16.mxu0 %vm8086_vm2, %v8084_v1 }
  0x42   : > { %6683 = vmatmul.mubr.msk.bf16.gmra.mrb[24].mxu0 %vm420_vm3, %v8049_v14 }
  0x43   : > { %6686 = vmatprep.mubr.msk.bf16.mxu0 %vm8086_vm2, %v8084_v1 }
  0x4a   : > { %6687 = vmatmul.mubr.msk.bf16.gmra.mrb[28].mxu0 %vm420_vm3, %v8050_v15  ;;  %v5835_v15 = vld [vmem:[%s9432_s2 + $0x110] sm:$0xff] }
  0x4b   : > { %6690 = vmatprep.mubr.msk.bf16.mxu0 %vm8086_vm2, %v8084_v1 }
  0x52   : > { %6691 = vmatmul.mubr.msk.bf16.gmra.mrb[32].mxu0 %vm420_vm3, %v8051_v16  ;;  %v5836_v16 = vld [vmem:[%s9432_s2 + $0x118] sm:$0xff] }
  0x53   : > { %6694 = vmatprep.mubr.msk.bf16.mxu0 %vm8086_vm2, %v8084_v1  ;;  %v7544_v23 = vpack.c.bf16 %v5836_v16, %v5835_v15 }
  0x5a   : > { %6695 = vmatmul.mubr.msk.bf16.gmra.mrb[36].mxu0 %vm420_vm3, %v8052_v17 }
  0x5b   : > { %6698 = vmatprep.mubr.msk.bf16.mxu0 %vm8086_vm2, %v8084_v1 }
  0x62   : > { %6699 = vmatmul.mubr.msk.bf16.gmra.mrb[40].mxu0 %vm420_vm3, %v8053_v18 }
  0x63   : > { %6702 = vmatprep.mubr.msk.bf16.mxu0 %vm8086_vm2, %v8084_v1 }
  0x6a   : > { %6703 = vmatmul.mubr.msk.bf16.gmra.mrb[44].mxu0 %vm420_vm3, %v8054_v21 }
  0x6b   : > { %6706 = vmatprep.mubr.msk.bf16.mxu0 %vm8086_vm2, %v8084_v1 }
  0x72   : > { %6707 = vmatmul.mubr.msk.bf16.gmra.mrb[48].mxu0 %vm420_vm3, %v8055_v29  ;;  %v824_v29 = vld [vmem:[%s9432_s2] sm:$0xff] }
  0x73   : > { %6710 = vmatprep.mubr.msk.bf16.mxu0 %vm8086_vm2, %v8084_v1  ;;  %v7492_v33 = vpack.c.bf16 %v825_v30, %v824_v29 }
  0x75   : > { %7493 = vmatprep.subr.bf16.mxu0 %v7492_v33 }
  0x7a   : > { %6711 = vmatmul.mubr.msk.bf16.gmra.mrb[52].mxu0 %vm420_vm3, %v8056_v41 }
  0x7b   : > { %6714 = vmatprep.mubr.msk.bf16.mxu0 %vm8086_vm2, %v8084_v1 }
  0x82   : > { %6715 = vmatmul.mubr.msk.bf16.gmra.mrb[56].mxu0 %vm420_vm3, %v8057_v46  ;;  %v7496_v46 = vpack.c.bf16 %v827_v45, %v826_v44 }
  0x83   : > { %6718 = vmatprep.mubr.msk.bf16.mxu0 %vm8086_vm2, %v8084_v1 }
  0x8a   : > { %6719 = vmatmul.mubr.msk.bf16.gmra.mrb[60].mxu0 %vm420_vm3, %v8058_v47 }
  0x8b   : > { %6722 = vmatprep.mubr.msk.bf16.mxu0 %vm8086_vm2, %v8084_v1 }
  0x92   : > { %6723 = vmatmul.mubr.msk.bf16.gmra.mrb[64].mxu0 %vm420_vm3, %v8059_v48  ;;  %v828_v48 = vld [vmem:[%s9432_s2 + $0x20] sm:$0xff] }
  0x93   : > { %6726 = vmatprep.mubr.msk.bf16.mxu0 %vm8086_vm2, %v8084_v1 }
  0x9a   : > { %6727 = vmatmul.mubr.msk.bf16.gmra.mrb[68].mxu0 %vm420_vm3, %v8060_v49  ;;  %v829_v49 = vld [vmem:[%s9432_s2 + $0x28] sm:$0xff] }
  0x9b   : > { %6730 = vmatprep.mubr.msk.bf16.mxu0 %vm8086_vm2, %v8084_v1 }
  0xa2   : > { %6731 = vmatmul.mubr.msk.bf16.gmra.mrb[72].mxu0 %vm420_vm3, %v8061_v50 }
  0xa3   : > { %6734 = vmatprep.mubr.msk.bf16.mxu0 %vm8086_vm2, %v8084_v1 }
  0xaa   : > { %6735 = vmatmul.mubr.msk.bf16.gmra.mrb[76].mxu0 %vm420_vm3, %v8062_v51 }
  0xab   : > { %6738 = vmatprep.mubr.msk.bf16.mxu0 %vm8086_vm2, %v8084_v1 }
  0xb2   : > { %6739 = vmatmul.mubr.msk.bf16.gmra.mrb[80].mxu0 %vm420_vm3, %v8063_v52  ;;  %v7500_v52 = vpack.c.bf16 %v829_v49, %v828_v48 }
  0xe5   : > { %v525_v56 = vpop.f32.mrb[0].mxu0 }
  0xe6   : > { %v692_v57 = vmax.f32 %v525_v56, 0.0  ;;  %v6660_v58 = vpop.f32.mrb[1].mxu0 }
  0xe7   : > { %v528_v59 = vpop.f32.mrb[2].mxu0 }
  0xe8   : > { %735 = vst.msk [vmem:[#allocation2] sm:$0xff] %vm734_vm4, %v692_v57  ;;  %v693_v60 = vmax.f32 %v528_v59, 0.0  ;;  %v6661_v61 = vpop.f32.mrb[3].mxu0 }
  0xe9   : > { %v831_v61 = vld [vmem:[%s9432_s2 + $0x38] sm:$0xff] }
  0xea   : > { %736 = vst.msk [vmem:[#allocation2 + $0x8] sm:$0xff] %vm734_vm4, %v693_v60  ;;  %v830_v60 = vld [vmem:[%s9432_s2 + $0x30] sm:$0xff] }
  0xed   : > { %v533_v62 = vpop.f32.mrb[4].mxu0 }
  0xee   : > { %v694_v63 = vmax.f32 %v533_v62, 0.0  ;;  %v6664_v0 = vpop.f32.mrb[5].mxu0  ;;  %v7504_v62 = vpack.c.bf16 %v831_v61, %v830_v60 }
  0xef   : > { %v536_v2 = vpop.f32.mrb[6].mxu0 }
  0xf0   : > { %737 = vst.msk [vmem:[#allocation2 + $0x10] sm:$0xff] %vm734_vm4, %v694_v63  ;;  %v695_v3 = vmax.f32 %v536_v2, 0.0  ;;  %v6665_v4 = vpop.f32.mrb[7].mxu0 }
  0xf1   : > { %v832_v5 = vld [vmem:[#allocation2 + $0x1] sm:$0xff]  ;;  %v5840_v4 = vld [vmem:[%s9432_s2 + $0x138] sm:$0xff] }
  0xf2   : > { %738 = vst.msk [vmem:[#allocation2 + $0x18] sm:$0xff] %vm734_vm4, %v695_v3  ;;  %6758 = vmatprep.mubr.msk.f32.mxu0 %vm734_vm4, %v832_v5  ;;  %v5839_v3 = vld [vmem:[%s9432_s2 + $0x130] sm:$0xff] }
  0xf5   : > { %v541_v6 = vpop.f32.mrb[8].mxu0 }
  0xf6   : > { %v696_v7 = vmax.f32 %v541_v6, 0.0  ;;  %v6668_v8 = vpop.f32.mrb[9].mxu0 }
  0xf7   : > { %v544_v9 = vpop.f32.mrb[10].mxu0  ;;  %v833_v10 = vld [vmem:[#allocation2 + $0x9] sm:$0xff]  ;;  %v7552_v8 = vpack.c.bf16 %v5840_v4, %v5839_v3 }
  0xf8   : > { %739 = vst.msk [vmem:[#allocation2 + $0x20] sm:$0xff] %vm734_vm4, %v696_v7  ;;  %v697_v11 = vmax.f32 %v544_v9, 0.0  ;;  %v6669_v12 = vpop.f32.mrb[11].mxu0  ;;  %6759 = vmatmul.mubr.msk.f32.vlgmr.msra.gmra.mrb[84].mxu0 %vm734_vm4, %v833_v10 }
  0xf9   : > { %v834_v13 = vld [vmem:[#allocation2 + $0x11] sm:$0xff]  ;;  %7495 = vmatpush3.bf16.msra.mxu0 %v7492_v33 }
  0xfa   : > { %v2179_v14 = vld [vmem:[#allocation2 + $0x12] sm:$0xff]  ;;  %740 = vst.msk [vmem:[#allocation2 + $0x28] sm:$0xff] %vm734_vm4, %v697_v11  ;;  %6761 = vmatprep.mubr.msk.f32.mxu0 %vm734_vm4, %v834_v13  ;;  %7497 = vmatprep.subr.bf16.mxu0 %v7496_v46 }
  0xfb   : > { %6995 = vmatprep.mubr.msk.f32.mxu1 %vm734_vm4, %v2179_v14 }
  0xfd   : > { %v549_v17 = vpop.f32.mrb[12].mxu0  ;;  %7499 = vmatpush3.bf16.msra.mxu0 %v7496_v46 }
  0xfe   : > { %v698_v18 = vmax.f32 %v549_v17, 0.0  ;;  %v6672_v19 = vpop.f32.mrb[13].mxu0  ;;  %7501 = vmatprep.subr.bf16.mxu0 %v7500_v52 }
  0xff   : > { %v552_v20 = vpop.f32.mrb[14].mxu0  ;;  %v835_v21 = vld [vmem:[#allocation2 + $0x19] sm:$0xff] }
 0x100   : > { %v2180_v22 = vld [vmem:[#allocation2 + $0x1a] sm:$0xff]  ;;  %741 = vst.msk [vmem:[#allocation2 + $0x30] sm:$0xff] %vm734_vm4, %v698_v18  ;;  %v699_v24 = vmax.f32 %v552_v20, 0.0  ;;  %v6673_v25 = vpop.f32.mrb[15].mxu0  ;;  %6762 = vmatmul.mubr.msk.f32.gmra.mrb[86].mxu0 %vm734_vm4, %v835_v21 }
 0x101   : > { %6996 = vmatmul.mubr.msk.f32.vlgmr.msra.gmra.mrb[0].mxu1 %vm734_vm4, %v2180_v22  ;;  %v836_v26 = vld [vmem:[#allocation2 + $0x21] sm:$0xff]  ;;  %7503 = vmatpush3.bf16.msra.mxu0 %v7500_v52 }
 0x102   : > { %v2181_v27 = vld [vmem:[#allocation2 + $0x22] sm:$0xff]  ;;  %7543 = vmatpush3.bf16.msra.mxu1 %v7540_v55  ;;  %742 = vst.msk [vmem:[#allocation2 + $0x38] sm:$0xff] %vm734_vm4, %v699_v24  ;;  %6764 = vmatprep.mubr.msk.f32.mxu0 %vm734_vm4, %v836_v26 }
 0x103   : > { %6998 = vmatprep.mubr.msk.f32.mxu1 %vm734_vm4, %v2181_v27  ;;  %7545 = vmatprep.subr.bf16.mxu1 %v7544_v23 }
 0x104   : > { %7505 = vmatprep.subr.bf16.mxu0 %v7504_v62 }
 0x105   : > { %v557_v28 = vpop.f32.mrb[16].mxu0  ;;  %7507 = vmatpush3.bf16.msra.mxu0 %v7504_v62 }
 0x106   : > { %7547 = vmatpush3.bf16.msra.mxu1 %v7544_v23  ;;  %v700_v31 = vmax.f32 %v557_v28, 0.0  ;;  %v6676_v32 = vpop.f32.mrb[17].mxu0 }
 0x107   : > { %v560_v34 = vpop.f32.mrb[18].mxu0  ;;  %v837_v35 = vld [vmem:[#allocation2 + $0x29] sm:$0xff]  ;;  %7549 = vmatprep.subr.bf16.mxu1 %v7548_v43 }
 0x108   : > { %v2182_v36 = vld [vmem:[#allocation2 + $0x2a] sm:$0xff]  ;;  %743 = vst.msk [vmem:[#allocation2 + $0x40] sm:$0xff] %vm734_vm4, %v700_v31  ;;  %v701_v37 = vmax.f32 %v560_v34, 0.0  ;;  %v6677_v38 = vpop.f32.mrb[19].mxu0  ;;  %6765 = vmatmul.mubr.msk.f32.gmra.mrb[88].mxu0 %vm734_vm4, %v837_v35  ;;  %v5883_v34 = vld [vmem:[%s9432_s2 + $0x140] sm:$0xff] }
 0x109   : > { %6999 = vmatmul.mubr.msk.f32.gmra.mrb[2].mxu1 %vm734_vm4, %v2182_v36  ;;  %v838_v41 = vld [vmem:[#allocation2 + $0x31] sm:$0xff]  ;;  %v5884_v35 = vld [vmem:[%s9432_s2 + $0x148] sm:$0xff] }
 0x10a   : > { %v2183_v42 = vld [vmem:[#allocation2 + $0x32] sm:$0xff]  ;;  %744 = vst.msk [vmem:[#allocation2 + $0x48] sm:$0xff] %vm734_vm4, %v701_v37  ;;  %6767 = vmatprep.mubr.msk.f32.mxu0 %vm734_vm4, %v838_v41  ;;  %7551 = vmatpush3.bf16.msra.mxu1 %v7548_v43  ;;  %v8394_v38 = vpack.c.bf16 %v5884_v35, %v5883_v34  ;;  %v5734_v34 = vld [vmem:[%s9432_s2 + $0x88] sm:$0xff] }
 0x10b   : > { %7001 = vmatprep.mubr.msk.f32.mxu1 %vm734_vm4, %v2183_v42  ;;  %7553 = vmatprep.subr.bf16.mxu1 %v7552_v8 }
 0x10d   : > { %v565_v47 = vpop.f32.mrb[20].mxu0 }
 0x10e   : > { %v702_v50 = vmax.f32 %v565_v47, 0.0  ;;  %v6680_v51 = vpop.f32.mrb[21].mxu0  ;;  %7555 = vmatpush3.bf16.msra.mxu1 %v7552_v8 }
 0x10f   : > { %v568_v53 = vpop.f32.mrb[22].mxu0  ;;  %v839_v54 = vld [vmem:[#allocation2 + $0x39] sm:$0xff]  ;;  %7557 = vmatprep.subr.bf16.mxu1 %v8394_v38 }
 0x110   : > { %v2184_v55 = vld [vmem:[#allocation2 + $0x3a] sm:$0xff]  ;;  %745 = vst.msk [vmem:[#allocation2 + $0x50] sm:$0xff] %vm734_vm4, %v702_v50  ;;  %v703_v56 = vmax.f32 %v568_v53, 0.0  ;;  %v6681_v57 = vpop.f32.mrb[23].mxu0  ;;  %6768 = vmatmul.mubr.msk.f32.gmra.mrb[90].mxu0 %vm734_vm4, %v839_v54 }
 0x111   : > { %7002 = vmatmul.mubr.msk.f32.gmra.mrb[4].mxu1 %vm734_vm4, %v2184_v55  ;;  %v840_v58 = vld [vmem:[#allocation2 + $0x41] sm:$0xff] }
 0x112   : > { %v2185_v59 = vld [vmem:[#allocation2 + $0x42] sm:$0xff]  ;;  %746 = vst.msk [vmem:[#allocation2 + $0x58] sm:$0xff] %vm734_vm4, %v703_v56  ;;  %6770 = vmatprep.mubr.msk.f32.mxu0 %vm734_vm4, %v840_v58 }
 0x113   : > { %7004 = vmatprep.mubr.msk.f32.mxu1 %vm734_vm4, %v2185_v59 }
 0x115   : > { %v573_v63 = vpop.f32.mrb[24].mxu0 }
 0x116   : > { %v704_v0 = vmax.f32 %v573_v63, 0.0  ;;  %v6684_v2 = vpop.f32.mrb[25].mxu0 }
 0x117   : > { %v576_v5 = vpop.f32.mrb[26].mxu0  ;;  %v841_v6 = vld [vmem:[#allocation2 + $0x49] sm:$0xff] }
 0x118   : > { %v2186_v7 = vld [vmem:[#allocation2 + $0x4a] sm:$0xff]  ;;  %747 = vst.msk [vmem:[#allocation2 + $0x60] sm:$0xff] %vm734_vm4, %v704_v0  ;;  %v705_v9 = vmax.f32 %v576_v5, 0.0  ;;  %v6685_v10 = vpop.f32.mrb[27].mxu0  ;;  %6771 = vmatmul.mubr.msk.f32.gmra.mrb[92].mxu0 %vm734_vm4, %v841_v6 }
 0x119   : > { %7005 = vmatmul.mubr.msk.f32.gmra.mrb[6].mxu1 %vm734_vm4, %v2186_v7  ;;  %v842_v11 = vld [vmem:[#allocation2 + $0x51] sm:$0xff] }
 0x11a   : > { %v2187_v12 = vld [vmem:[#allocation2 + $0x52] sm:$0xff]  ;;  %748 = vst.msk [vmem:[#allocation2 + $0x68] sm:$0xff] %vm734_vm4, %v705_v9  ;;  %6773 = vmatprep.mubr.msk.f32.mxu0 %vm734_vm4, %v842_v11 }
 0x11b   : > { %7007 = vmatprep.mubr.msk.f32.mxu1 %vm734_vm4, %v2187_v12 }
 0x11d   : > { %v581_v13 = vpop.f32.mrb[28].mxu0 }
 0x11e   : > { %v706_v14 = vmax.f32 %v581_v13, 0.0  ;;  %v6688_v15 = vpop.f32.mrb[29].mxu0 }
 0x11f   : > { %v584_v16 = vpop.f32.mrb[30].mxu0  ;;  %v843_v17 = vld [vmem:[#allocation2 + $0x59] sm:$0xff] }
 0x120   : > { %v2188_v18 = vld [vmem:[#allocation2 + $0x5a] sm:$0xff]  ;;  %749 = vst.msk [vmem:[#allocation2 + $0x70] sm:$0xff] %vm734_vm4, %v706_v14  ;;  %v707_v19 = vmax.f32 %v584_v16, 0.0  ;;  %v6689_v20 = vpop.f32.mrb[31].mxu0  ;;  %6774 = vmatmul.mubr.msk.f32.gmra.mrb[94].mxu0 %vm734_vm4, %v843_v17 }
 0x121   : > { %7008 = vmatmul.mubr.msk.f32.gmra.mrb[8].mxu1 %vm734_vm4, %v2188_v18  ;;  %v844_v21 = vld [vmem:[#allocation2 + $0x61] sm:$0xff] }
 0x122   : > { %v2189_v22 = vld [vmem:[#allocation2 + $0x62] sm:$0xff]  ;;  %750 = vst.msk [vmem:[#allocation2 + $0x78] sm:$0xff] %vm734_vm4, %v707_v19  ;;  %6776 = vmatprep.mubr.msk.f32.mxu0 %vm734_vm4, %v844_v21 }
 0x123   : > { %7010 = vmatprep.mubr.msk.f32.mxu1 %vm734_vm4, %v2189_v22 }
 0x125   : > { %v589_v23 = vpop.f32.mrb[32].mxu0 }
 0x126   : > { %v708_v24 = vmax.f32 %v589_v23, 0.0  ;;  %v6692_v25 = vpop.f32.mrb[33].mxu0 }
 0x127   : > { %v592_v26 = vpop.f32.mrb[34].mxu0  ;;  %v845_v27 = vld [vmem:[#allocation2 + $0x69] sm:$0xff] }
 0x128   : > { %v2190_v28 = vld [vmem:[#allocation2 + $0x6a] sm:$0xff]  ;;  %751 = vst.msk [vmem:[#allocation2 + $0x80] sm:$0xff] %vm734_vm4, %v708_v24  ;;  %v709_v29 = vmax.f32 %v592_v26, 0.0  ;;  %v6693_v30 = vpop.f32.mrb[35].mxu0  ;;  %6777 = vmatmul.mubr.msk.f32.gmra.mrb[96].mxu0 %vm734_vm4, %v845_v27 }
 0x129   : > { %7011 = vmatmul.mubr.msk.f32.gmra.mrb[10].mxu1 %vm734_vm4, %v2190_v28  ;;  %v846_v31 = vld [vmem:[#allocation2 + $0x71] sm:$0xff] }
 0x12a   : > { %v2191_v32 = vld [vmem:[#allocation2 + $0x72] sm:$0xff]  ;;  %752 = vst.msk [vmem:[#allocation2 + $0x88] sm:$0xff] %vm734_vm4, %v709_v29  ;;  %6779 = vmatprep.mubr.msk.f32.mxu0 %vm734_vm4, %v846_v31 }
 0x12b   : > { %7013 = vmatprep.mubr.msk.f32.mxu1 %vm734_vm4, %v2191_v32 }
 0x12d   : > { %v597_v33 = vpop.f32.mrb[36].mxu0 }
 0x12e   : > { %v710_v36 = vmax.f32 %v597_v33, 0.0  ;;  %v6696_v37 = vpop.f32.mrb[37].mxu0  ;;  %v5733_v33 = vld [vmem:[%s9432_s2 + $0x80] sm:$0xff] }
 0x12f   : > { %v600_v39 = vpop.f32.mrb[38].mxu0  ;;  %v847_v40 = vld [vmem:[#allocation2 + $0x79] sm:$0xff]  ;;  %v8475_v35 = vpack.c.bf16 %v5734_v34, %v5733_v33 }
 0x130   : > { %v8396_v41 = vld [vmem:[#allocation2 + $0x7a] sm:$0xff]  ;;  %753 = vst.msk [vmem:[#allocation2 + $0x90] sm:$0xff] %vm734_vm4, %v710_v36  ;;  %v711_v42 = vmax.f32 %v600_v39, 0.0  ;;  %v6697_v43 = vpop.f32.mrb[39].mxu0  ;;  %6780 = vmatmul.mubr.msk.f32.gmra.mrb[98].mxu0 %vm734_vm4, %v847_v40 }
 0x131   : > { %7014 = vmatmul.mubr.msk.f32.gmra.mrb[12].mxu1 %vm734_vm4, %v8396_v41  ;;  %v848_v44 = vld [vmem:[#allocation2 + $0x81] sm:$0xff]  ;;  %7509 = vmatprep.subr.bf16.mxu0 %v8475_v35 }
 0x132   : > { %v8402_v45 = vld [vmem:[#allocation2 + $0x82] sm:$0xff]  ;;  %754 = vst.msk [vmem:[#allocation2 + $0x98] sm:$0xff] %vm734_vm4, %v711_v42  ;;  %6782 = vmatprep.mubr.msk.f32.mxu0 %vm734_vm4, %v848_v44 }
 0x133   : > { %7016 = vmatprep.mubr.msk.f32.mxu1 %vm734_vm4, %v8402_v45 }
 0x135   : > { %v605_v46 = vpop.f32.mrb[40].mxu0 }
 0x136   : > { %v712_v47 = vmax.f32 %v605_v46, 0.0  ;;  %v6700_v48 = vpop.f32.mrb[41].mxu0 }
 0x137   : > { %v608_v49 = vpop.f32.mrb[42].mxu0  ;;  %v849_v50 = vld [vmem:[#allocation2 + $0x89] sm:$0xff] }
 0x138   : > { %v8409_v51 = vld [vmem:[#allocation2 + $0x8a] sm:$0xff]  ;;  %755 = vst.msk [vmem:[#allocation2 + $0xa0] sm:$0xff] %vm734_vm4, %v712_v47  ;;  %v713_v52 = vmax.f32 %v608_v49, 0.0  ;;  %v6701_v53 = vpop.f32.mrb[43].mxu0  ;;  %6783 = vmatmul.mubr.msk.f32.gmra.mrb[100].mxu0 %vm734_vm4, %v849_v50 }
 0x139   : > { %7017 = vmatmul.mubr.msk.f32.gmra.mrb[14].mxu1 %vm734_vm4, %v8409_v51  ;;  %v850_v54 = vld [vmem:[#allocation2 + $0x91] sm:$0xff] }
 0x13a   : > { %v8415_v55 = vld [vmem:[#allocation2 + $0x92] sm:$0xff]  ;;  %756 = vst.msk [vmem:[#allocation2 + $0xa8] sm:$0xff] %vm734_vm4, %v713_v52  ;;  %6785 = vmatprep.mubr.msk.f32.mxu0 %vm734_vm4, %v850_v54 }
 0x13b   : > { %7019 = vmatprep.mubr.msk.f32.mxu1 %vm734_vm4, %v8415_v55 }
 0x13d   : > { %v613_v56 = vpop.f32.mrb[44].mxu0 }
 0x13e   : > { %v714_v57 = vmax.f32 %v613_v56, 0.0  ;;  %v6704_v58 = vpop.f32.mrb[45].mxu0 }
 0x13f   : > { %v616_v59 = vpop.f32.mrb[46].mxu0  ;;  %v851_v60 = vld [vmem:[#allocation2 + $0x99] sm:$0xff] }
 0x140   : > { %v8421_v61 = vld [vmem:[#allocation2 + $0x9a] sm:$0xff]  ;;  %757 = vst.msk [vmem:[#allocation2 + $0xb0] sm:$0xff] %vm734_vm4, %v714_v57  ;;  %v715_v62 = vmax.f32 %v616_v59, 0.0  ;;  %v6705_v63 = vpop.f32.mrb[47].mxu0  ;;  %6786 = vmatmul.mubr.msk.f32.gmra.mrb[102].mxu0 %vm734_vm4, %v851_v60 }
 0x141   : > { %7020 = vmatmul.mubr.msk.f32.gmra.mrb[16].mxu1 %vm734_vm4, %v8421_v61  ;;  %v852_v0 = vld [vmem:[#allocation2 + $0xa1] sm:$0xff] }
 0x142   : > { %v8427_v2 = vld [vmem:[#allocation2 + $0xa2] sm:$0xff]  ;;  %758 = vst.msk [vmem:[#allocation2 + $0xb8] sm:$0xff] %vm734_vm4, %v715_v62  ;;  %6788 = vmatprep.mubr.msk.f32.mxu0 %vm734_vm4, %v852_v0 }
 0x143   : > { %7022 = vmatprep.mubr.msk.f32.mxu1 %vm734_vm4, %v8427_v2 }
 0x145   : > { %v621_v3 = vpop.f32.mrb[48].mxu0 }
 0x146   : > { %v716_v4 = vmax.f32 %v621_v3, 0.0  ;;  %v6708_v5 = vpop.f32.mrb[49].mxu0 }
 0x147   : > { %v624_v6 = vpop.f32.mrb[50].mxu0  ;;  %v853_v7 = vld [vmem:[#allocation2 + $0xa9] sm:$0xff] }
 0x148   : > { %v8433_v8 = vld [vmem:[#allocation2 + $0xaa] sm:$0xff]  ;;  %759 = vst.msk [vmem:[#allocation2 + $0xc0] sm:$0xff] %vm734_vm4, %v716_v4  ;;  %v717_v9 = vmax.f32 %v624_v6, 0.0  ;;  %v6709_v10 = vpop.f32.mrb[51].mxu0  ;;  %6789 = vmatmul.mubr.msk.f32.gmra.mrb[104].mxu0 %vm734_vm4, %v853_v7 }
 0x149   : > { %7023 = vmatmul.mubr.msk.f32.gmra.mrb[18].mxu1 %vm734_vm4, %v8433_v8  ;;  %v854_v11 = vld [vmem:[#allocation2 + $0xb1] sm:$0xff] }
 0x14a   : > { %v8439_v12 = vld [vmem:[#allocation2 + $0xb2] sm:$0xff]  ;;  %760 = vst.msk [vmem:[#allocation2 + $0xc8] sm:$0xff] %vm734_vm4, %v717_v9  ;;  %6791 = vmatprep.mubr.msk.f32.mxu0 %vm734_vm4, %v854_v11 }
 0x14b   : > { %7025 = vmatprep.mubr.msk.f32.mxu1 %vm734_vm4, %v8439_v12 }
 0x14d   : > { %v629_v13 = vpop.f32.mrb[52].mxu0 }
 0x14e   : > { %v718_v14 = vmax.f32 %v629_v13, 0.0  ;;  %v6712_v15 = vpop.f32.mrb[53].mxu0 }
 0x14f   : > { %v632_v16 = vpop.f32.mrb[54].mxu0  ;;  %v855_v17 = vld [vmem:[#allocation2 + $0xb9] sm:$0xff] }
 0x150   : > { %v8445_v18 = vld [vmem:[#allocation2 + $0xba] sm:$0xff]  ;;  %761 = vst.msk [vmem:[#allocation2 + $0xd0] sm:$0xff] %vm734_vm4, %v718_v14  ;;  %v719_v19 = vmax.f32 %v632_v16, 0.0  ;;  %v6713_v20 = vpop.f32.mrb[55].mxu0  ;;  %6792 = vmatmul.mubr.msk.f32.gmra.mrb[106].mxu0 %vm734_vm4, %v855_v17 }
 0x151   : > { %7026 = vmatmul.mubr.msk.f32.gmra.mrb[20].mxu1 %vm734_vm4, %v8445_v18  ;;  %v856_v21 = vld [vmem:[#allocation2 + $0xc1] sm:$0xff] }
 0x152   : > { %v8451_v22 = vld [vmem:[#allocation2 + $0xc2] sm:$0xff]  ;;  %762 = vst.msk [vmem:[#allocation2 + $0xd8] sm:$0xff] %vm734_vm4, %v719_v19  ;;  %6794 = vmatprep.mubr.msk.f32.mxu0 %vm734_vm4, %v856_v21 }
 0x153   : > { %7028 = vmatprep.mubr.msk.f32.mxu1 %vm734_vm4, %v8451_v22 }
 0x155   : > { %v637_v23 = vpop.f32.mrb[56].mxu0 }
 0x156   : > { %v720_v24 = vmax.f32 %v637_v23, 0.0  ;;  %v6716_v25 = vpop.f32.mrb[57].mxu0 }
 0x157   : > { %v640_v26 = vpop.f32.mrb[58].mxu0  ;;  %v857_v27 = vld [vmem:[#allocation2 + $0xc9] sm:$0xff] }
 0x158   : > { %v8457_v28 = vld [vmem:[#allocation2 + $0xca] sm:$0xff]  ;;  %763 = vst.msk [vmem:[#allocation2 + $0xe0] sm:$0xff] %vm734_vm4, %v720_v24  ;;  %v721_v29 = vmax.f32 %v640_v26, 0.0  ;;  %v6717_v30 = vpop.f32.mrb[59].mxu0  ;;  %6795 = vmatmul.mubr.msk.f32.gmra.mrb[108].mxu0 %vm734_vm4, %v857_v27 }
 0x159   : > { %7029 = vmatmul.mubr.msk.f32.gmra.mrb[22].mxu1 %vm734_vm4, %v8457_v28  ;;  %v858_v31 = vld [vmem:[#allocation2 + $0xd1] sm:$0xff] }
 0x15a   : > { %v8463_v32 = vld [vmem:[#allocation2 + $0xd2] sm:$0xff]  ;;  %764 = vst.msk [vmem:[#allocation2 + $0xe8] sm:$0xff] %vm734_vm4, %v721_v29  ;;  %6797 = vmatprep.mubr.msk.f32.mxu0 %vm734_vm4, %v858_v31 }
 0x15b   : > { %7031 = vmatprep.mubr.msk.f32.mxu1 %vm734_vm4, %v8463_v32 }
 0x15d   : > { %v645_v36 = vpop.f32.mrb[60].mxu0 }
 0x15e   : > { %v722_v37 = vmax.f32 %v645_v36, 0.0  ;;  %v6720_v39 = vpop.f32.mrb[61].mxu0 }
 0x15f   : > { %v648_v40 = vpop.f32.mrb[62].mxu0  ;;  %v859_v42 = vld [vmem:[#allocation2 + $0xd9] sm:$0xff] }
 0x160   : > { %v8478_v43 = vld [vmem:[#allocation2 + $0xda] sm:$0xff]  ;;  %765 = vst.msk [vmem:[#allocation2 + $0xf0] sm:$0xff] %vm734_vm4, %v722_v37  ;;  %v723_v44 = vmax.f32 %v648_v40, 0.0  ;;  %v6721_v46 = vpop.f32.mrb[63].mxu0  ;;  %6798 = vmatmul.mubr.msk.f32.gmra.mrb[110].mxu0 %vm734_vm4, %v859_v42 }
 0x161   : > { %7032 = vmatmul.mubr.msk.f32.gmra.mrb[24].mxu1 %vm734_vm4, %v8478_v43  ;;  %v860_v47 = vld [vmem:[#allocation2 + $0xe1] sm:$0xff] }
 0x162   : > { %v8484_v48 = vld [vmem:[#allocation2 + $0xe2] sm:$0xff]  ;;  %766 = vst.msk [vmem:[#allocation2 + $0xf8] sm:$0xff] %vm734_vm4, %v723_v44  ;;  %6800 = vmatprep.mubr.msk.f32.mxu0 %vm734_vm4, %v860_v47 }
 0x163   : > { %7034 = vmatprep.mubr.msk.f32.mxu1 %vm734_vm4, %v8484_v48 }
 0x165   : > { %v653_v49 = vpop.f32.mrb[64].mxu0 }
 0x166   : > { %v724_v50 = vmax.f32 %v653_v49, 0.0  ;;  %v6724_v52 = vpop.f32.mrb[65].mxu0 }
 0x167   : > { %v656_v53 = vpop.f32.mrb[66].mxu0  ;;  %v861_v54 = vld [vmem:[#allocation2 + $0xe9] sm:$0xff] }
 0x168   : > { %v8490_v56 = vld [vmem:[#allocation2 + $0xea] sm:$0xff]  ;;  %767 = vst.msk [vmem:[#allocation2 + $0x100] sm:$0xff] %vm734_vm4, %v724_v50  ;;  %v725_v57 = vmax.f32 %v656_v53, 0.0  ;;  %v6725_v58 = vpop.f32.mrb[67].mxu0  ;;  %6801 = vmatmul.mubr.msk.f32.gmra.mrb[112].mxu0 %vm734_vm4, %v861_v54 }
 0x169   : > { %7035 = vmatmul.mubr.msk.f32.gmra.mrb[26].mxu1 %vm734_vm4, %v8490_v56  ;;  %v862_v59 = vld [vmem:[#allocation2 + $0xf1] sm:$0xff] }
 0x16a   : > { %v8496_v60 = vld [vmem:[#allocation2 + $0xf2] sm:$0xff]  ;;  %768 = vst.msk [vmem:[#allocation2 + $0x108] sm:$0xff] %vm734_vm4, %v725_v57  ;;  %6803 = vmatprep.mubr.msk.f32.mxu0 %vm734_vm4, %v862_v59 }
 0x16b   : > { %7037 = vmatprep.mubr.msk.f32.mxu1 %vm734_vm4, %v8496_v60  ;;  %v2219_v59 = vld [vmem:[#allocation2 + $0x152] sm:$0xff] }
 0x16d   : > { %v661_v62 = vpop.f32.mrb[68].mxu0 }
 0x16e   : > { %v726_v63 = vmax.f32 %v661_v62, 0.0  ;;  %v6728_v0 = vpop.f32.mrb[69].mxu0 }
 0x16f   : > { %v664_v3 = vpop.f32.mrb[70].mxu0  ;;  %v863_v4 = vld [vmem:[#allocation2 + $0xf9] sm:$0xff] }
 0x170   : > { %v8502_v5 = vld [vmem:[#allocation2 + $0xfa] sm:$0xff]  ;;  %769 = vst.msk [vmem:[#allocation2 + $0x110] sm:$0xff] %vm734_vm4, %v726_v63  ;;  %v727_v6 = vmax.f32 %v664_v3, 0.0  ;;  %v6729_v7 = vpop.f32.mrb[71].mxu0  ;;  %6804 = vmatmul.mubr.msk.f32.gmra.mrb[114].mxu0 %vm734_vm4, %v863_v4  ;;  %v5735_v3 = vld [vmem:[%s9432_s2 + $0x90] sm:$0xff] }
 0x171   : > { %7038 = vmatmul.mubr.msk.f32.gmra.mrb[28].mxu1 %vm734_vm4, %v8502_v5  ;;  %v864_v9 = vld [vmem:[#allocation2 + $0x101] sm:$0xff]  ;;  %v5736_v4 = vld [vmem:[%s9432_s2 + $0x98] sm:$0xff] }
 0x172   : > { %v8508_v10 = vld [vmem:[#allocation2 + $0x102] sm:$0xff]  ;;  %770 = vst.msk [vmem:[#allocation2 + $0x118] sm:$0xff] %vm734_vm4, %v727_v6  ;;  %6806 = vmatprep.mubr.msk.f32.mxu0 %vm734_vm4, %v864_v9  ;;  %v2220_v6 = vld [vmem:[#allocation2 + $0x15a] sm:$0xff]  ;;  %v784_v9 = vld [vmem:[#allocation2 + $0x10] sm:$0xff] }
 0x173   : > { %7040 = vmatprep.mubr.msk.f32.mxu1 %vm734_vm4, %v8508_v10  ;;  %v782_v0 = vld [vmem:[#allocation2] sm:$0xff]  ;;  %v783_v7 = vld [vmem:[#allocation2 + $0x8] sm:$0xff] }
 0x175   : > { %v669_v11 = vpop.f32.mrb[72].mxu0 }
 0x176   : > { %v728_v13 = vmax.f32 %v669_v11, 0.0  ;;  %v6732_v14 = vpop.f32.mrb[73].mxu0  ;;  %v2673_v11 = vld [vmem:[#allocation2 + $0x13] sm:$0xff] }
 0x177   : > { %v672_v15 = vpop.f32.mrb[74].mxu0  ;;  %v865_v16 = vld [vmem:[#allocation2 + $0x109] sm:$0xff]  ;;  %v7512_v14 = vpack.c.bf16 %v5736_v4, %v5735_v3 }
 0x178   : > { %v8514_v17 = vld [vmem:[#allocation2 + $0x10a] sm:$0xff]  ;;  %771 = vst.msk [vmem:[#allocation2 + $0x120] sm:$0xff] %vm734_vm4, %v728_v13  ;;  %v729_v19 = vmax.f32 %v672_v15, 0.0  ;;  %v6733_v20 = vpop.f32.mrb[75].mxu0  ;;  %6807 = vmatmul.mubr.msk.f32.gmra.mrb[116].mxu0 %vm734_vm4, %v865_v16  ;;  %v5886_v15 = vld [vmem:[%s9432_s2 + $0x158] sm:$0xff]  ;;  %v5737_v16 = vld [vmem:[%s9432_s2 + $0xa0] sm:$0xff] }
 0x179   : > { %7041 = vmatmul.mubr.msk.f32.gmra.mrb[30].mxu1 %vm734_vm4, %v8514_v17  ;;  %v866_v21 = vld [vmem:[#allocation2 + $0x111] sm:$0xff]  ;;  %v791_v3 = vld [vmem:[#allocation2 + $0x48] sm:$0xff] }
 0x17a   : > { %v8520_v23 = vld [vmem:[#allocation2 + $0x112] sm:$0xff]  ;;  %772 = vst.msk [vmem:[#allocation2 + $0x128] sm:$0xff] %vm734_vm4, %v729_v19  ;;  %6809 = vmatprep.mubr.msk.f32.mxu0 %vm734_vm4, %v866_v21  ;;  %v5738_v19 = vld [vmem:[%s9432_s2 + $0xa8] sm:$0xff]  ;;  %v2674_v21 = vld [vmem:[#allocation2 + $0x1b] sm:$0xff] }
 0x17b   : > { %7043 = vmatprep.mubr.msk.f32.mxu1 %vm734_vm4, %v8520_v23  ;;  %v5885_v13 = vld [vmem:[%s9432_s2 + $0x150] sm:$0xff]  ;;  %v785_v20 = vld [vmem:[#allocation2 + $0x18] sm:$0xff] }
 0x17c   : > { %v2680_v4 = vld [vmem:[#allocation2 + $0x4b] sm:$0xff] }
 0x17d   : > { %v677_v24 = vpop.f32.mrb[76].mxu0 }
 0x17e   : > { %v730_v25 = vmax.f32 %v677_v24, 0.0  ;;  %v6736_v26 = vpop.f32.mrb[77].mxu0  ;;  %v786_v24 = vld [vmem:[#allocation2 + $0x20] sm:$0xff] }
 0x17f   : > { %v680_v27 = vpop.f32.mrb[78].mxu0  ;;  %v867_v29 = vld [vmem:[#allocation2 + $0x119] sm:$0xff]  ;;  %v7560_v26 = vpack.c.bf16 %v5886_v15, %v5885_v13  ;;  %v2683_v15 = vld [vmem:[#allocation2 + $0x63] sm:$0xff] }
 0x180   : > { %v8526_v30 = vld [vmem:[#allocation2 + $0x11a] sm:$0xff]  ;;  %773 = vst.msk [vmem:[#allocation2 + $0x130] sm:$0xff] %vm734_vm4, %v730_v25  ;;  %v731_v31 = vmax.f32 %v680_v27, 0.0  ;;  %v6737_v33 = vpop.f32.mrb[79].mxu0  ;;  %6810 = vmatmul.mubr.msk.f32.gmra.mrb[118].mxu0 %vm734_vm4, %v867_v29  ;;  %v2675_v25 = vld [vmem:[#allocation2 + $0x23] sm:$0xff]  ;;  %v7516_v29 = vpack.c.bf16 %v5738_v19, %v5737_v16  ;;  %v2684_v19 = vld [vmem:[#allocation2 + $0x6b] sm:$0xff] }
 0x181   : > { %7044 = vmatmul.mubr.msk.f32.gmra.mrb[32].mxu1 %vm734_vm4, %v8526_v30  ;;  %v868_v34 = vld [vmem:[#allocation2 + $0x121] sm:$0xff]  ;;  %v5740_v33 = vld [vmem:[%s9432_s2 + $0xb8] sm:$0xff] }
 0x182   : > { %v8532_v36 = vld [vmem:[#allocation2 + $0x122] sm:$0xff]  ;;  %774 = vst.msk [vmem:[#allocation2 + $0x138] sm:$0xff] %vm734_vm4, %v731_v31  ;;  %6812 = vmatprep.mubr.msk.f32.mxu0 %vm734_vm4, %v868_v34 }
 0x183   : > { %7046 = vmatprep.mubr.msk.f32.mxu1 %vm734_vm4, %v8532_v36  ;;  %v5887_v27 = vld [vmem:[%s9432_s2 + $0x160] sm:$0xff]  ;;  %v5888_v31 = vld [vmem:[%s9432_s2 + $0x168] sm:$0xff] }
 0x184   : > { %v787_v34 = vld [vmem:[#allocation2 + $0x28] sm:$0xff]  ;;  %v2682_v13 = vld [vmem:[#allocation2 + $0x5b] sm:$0xff] }
 0x185   : > { %v685_v37 = vpop.f32.mrb[80].mxu0  ;;  %v795_v16 = vld [vmem:[#allocation2 + $0x68] sm:$0xff] }
 0x186   : > { %v732_v39 = vmax.f32 %v685_v37, 0.0  ;;  %v6740_v40 = vpop.f32.mrb[81].mxu0  ;;  %v2676_v37 = vld [vmem:[#allocation2 + $0x2b] sm:$0xff] }
 0x187   : > { %v688_v42 = vpop.f32.mrb[82].mxu0  ;;  %v869_v44 = vld [vmem:[#allocation2 + $0x129] sm:$0xff]  ;;  %v7564_v40 = vpack.c.bf16 %v5888_v31, %v5887_v27 }
 0x188   : > { %v8538_v46 = vld [vmem:[#allocation2 + $0x12a] sm:$0xff]  ;;  %775 = vst.msk [vmem:[#allocation2 + $0x140] sm:$0xff] %vm734_vm4, %v732_v39  ;;  %v733_v47 = vmax.f32 %v688_v42, 0.0  ;;  %v6741_v49 = vpop.f32.mrb[83].mxu0  ;;  %6813 = vmatmul.mubr.msk.f32.gmra.mrb[120].mxu0 %vm734_vm4, %v869_v44  ;;  %v2677_v44 = vld [vmem:[#allocation2 + $0x33] sm:$0xff] }
 0x189   : > { %7047 = vmatmul.mubr.msk.f32.gmra.mrb[34].mxu1 %vm734_vm4, %v8538_v46  ;;  %v870_v50 = vld [vmem:[#allocation2 + $0x131] sm:$0xff]  ;;  %v2687_v27 = vld [vmem:[#allocation2 + $0x83] sm:$0xff] }
 0x18a   : > { %v8544_v52 = vld [vmem:[#allocation2 + $0x132] sm:$0xff]  ;;  %776 = vst.msk [vmem:[#allocation2 + $0x148] sm:$0xff] %vm734_vm4, %v733_v47  ;;  %6815 = vmatprep.mubr.msk.f32.mxu0 %vm734_vm4, %v870_v50  ;;  %v2678_v50 = vld [vmem:[#allocation2 + $0x3b] sm:$0xff] }
 0x18b   : > { %7049 = vmatprep.mubr.msk.f32.mxu1 %vm734_vm4, %v8544_v52  ;;  %v788_v39 = vld [vmem:[#allocation2 + $0x30] sm:$0xff]  ;;  %v789_v49 = vld [vmem:[#allocation2 + $0x38] sm:$0xff] }
 0x18c   : > { %v5889_v47 = vld [vmem:[%s9432_s2 + $0x170] sm:$0xff] }
 0x18d   : > { %v2688_v31 = vld [vmem:[#allocation2 + $0x8b] sm:$0xff] }
 0x18f   : > { %v871_v53 = vld [vmem:[#allocation2 + $0x139] sm:$0xff] }
 0x190   : > { %v8550_v54 = vld [vmem:[#allocation2 + $0x13a] sm:$0xff]  ;;  %6816 = vmatmul.mubr.msk.f32.gmra.mrb[122].mxu0 %vm734_vm4, %v871_v53 }
 0x191   : > { %7050 = vmatmul.mubr.msk.f32.gmra.mrb[36].mxu1 %vm734_vm4, %v8550_v54  ;;  %v872_v57 = vld [vmem:[#allocation2 + $0x141] sm:$0xff]  ;;  %v873_v62 = vld [vmem:[#allocation2 + $0x149] sm:$0xff] }
 0x192   : > { %v8555_v58 = vld [vmem:[#allocation2 + $0x142] sm:$0xff]  ;;  %6818 = vmatprep.mubr.msk.f32.mxu0 %vm734_vm4, %v872_v57  ;;  %v8560_v63 = vld [vmem:[#allocation2 + $0x14a] sm:$0xff] }
 0x193   : > { %7052 = vmatprep.mubr.msk.f32.mxu1 %vm734_vm4, %v8555_v58  ;;  %v790_v53 = vld [vmem:[#allocation2 + $0x40] sm:$0xff] }
 0x194   : > { %6819 = vmatmul.mubr.msk.f32.gmra.mrb[124].mxu0 %vm734_vm4, %v873_v62  ;;  %v5933_v62 = vld [vmem:[%s9432_s2 + $0x180] sm:$0xff] }
 0x195   : > { %7053 = vmatmul.mubr.msk.f32.gmra.mrb[38].mxu1 %vm734_vm4, %v8560_v63  ;;  %6837 = vmatprep.mubr.msk.f32.mxu0 %vm734_vm4, %v782_v0  ;;  %v5934_v0 = vld [vmem:[%s9432_s2 + $0x188] sm:$0xff] }
 0x196   : > { %7055 = vmatprep.mubr.msk.f32.mxu1 %vm734_vm4, %v2219_v59  ;;  %v2679_v59 = vld [vmem:[#allocation2 + $0x43] sm:$0xff] }
 0x198   : > { %6838 = vmatmul.mubr.msk.f32.vlgmr.msra.gmra.mrb[84].mxu0 %vm734_vm4, %v783_v7  ;;  %v792_v7 = vld [vmem:[#allocation2 + $0x50] sm:$0xff] }
 0x199   : > { %7056 = vmatmul.mubr.msk.f32.gmra.mrb[40].mxu1 %vm734_vm4, %v2220_v6  ;;  %6840 = vmatprep.mubr.msk.f32.mxu0 %vm734_vm4, %v784_v9  ;;  %v8627_v6 = vpack.c.bf16 %v5934_v0, %v5933_v62  ;;  %v2681_v9 = vld [vmem:[#allocation2 + $0x53] sm:$0xff]  ;;  %v2696_v62 = vld [vmem:[#allocation2 + $0xcb] sm:$0xff] }
 0x19a   : > { %7074 = vmatprep.mubr.msk.f32.mxu1 %vm734_vm4, %v2673_v11  ;;  %7511 = vmatpush3.bf16.msra.mxu0 %v8475_v35  ;;  %v5739_v35 = vld [vmem:[%s9432_s2 + $0xb0] sm:$0xff]  ;;  %v793_v11 = vld [vmem:[#allocation2 + $0x58] sm:$0xff] }
 0x19b   : > { %7513 = vmatprep.subr.bf16.mxu0 %v7512_v14  ;;  %v7520_v42 = vpack.c.bf16 %v5740_v33, %v5739_v35  ;;  %v800_v35 = vld [vmem:[#allocation2 + $0x90] sm:$0xff] }
 0x19c   : > { %6841 = vmatmul.mubr.msk.f32.gmra.mrb[86].mxu0 %vm734_vm4, %v785_v20  ;;  %v796_v20 = vld [vmem:[#allocation2 + $0x70] sm:$0xff] }
 0x19d   : > { %7075 = vmatmul.mubr.msk.f32.vlgmr.msra.gmra.mrb[0].mxu1 %vm734_vm4, %v2674_v21  ;;  %6843 = vmatprep.mubr.msk.f32.mxu0 %vm734_vm4, %v786_v24  ;;  %v2685_v21 = vld [vmem:[#allocation2 + $0x73] sm:$0xff] }
 0x19e   : > { %7077 = vmatprep.mubr.msk.f32.mxu1 %vm734_vm4, %v2675_v25  ;;  %7559 = vmatpush3.bf16.msra.mxu1 %v8394_v38  ;;  %v5890_v38 = vld [vmem:[%s9432_s2 + $0x178] sm:$0xff]  ;;  %v808_v0 = vld [vmem:[#allocation2 + $0xd0] sm:$0xff] }
 0x19f   : > { %7515 = vmatpush3.bf16.msra.mxu0 %v7512_v14  ;;  %7561 = vmatprep.subr.bf16.mxu1 %v7560_v26  ;;  %v7568_v57 = vpack.c.bf16 %v5890_v38, %v5889_v47  ;;  %v794_v14 = vld [vmem:[#allocation2 + $0x60] sm:$0xff]  ;;  %v797_v24 = vld [vmem:[#allocation2 + $0x78] sm:$0xff]  ;;  %v804_v47 = vld [vmem:[#allocation2 + $0xb0] sm:$0xff] }
 0x1a0   : > { %7517 = vmatprep.subr.bf16.mxu0 %v7516_v29  ;;  %6844 = vmatmul.mubr.msk.f32.gmra.mrb[88].mxu0 %vm734_vm4, %v787_v34  ;;  %v2686_v25 = vld [vmem:[#allocation2 + $0x7b] sm:$0xff]  ;;  %v2689_v33 = vld [vmem:[#allocation2 + $0x93] sm:$0xff] }
 0x1a1   : > { %7078 = vmatmul.mubr.msk.f32.gmra.mrb[2].mxu1 %vm734_vm4, %v2676_v37  ;;  %6846 = vmatprep.mubr.msk.f32.mxu0 %vm734_vm4, %v788_v39  ;;  %v801_v34 = vld [vmem:[#allocation2 + $0x98] sm:$0xff]  ;;  %v802_v39 = vld [vmem:[#allocation2 + $0xa0] sm:$0xff] }
 0x1a2   : > { %7080 = vmatprep.mubr.msk.f32.mxu1 %vm734_vm4, %v2677_v44  ;;  %7563 = vmatpush3.bf16.msra.mxu1 %v7560_v26  ;;  %v798_v26 = vld [vmem:[#allocation2 + $0x80] sm:$0xff]  ;;  %v2692_v44 = vld [vmem:[#allocation2 + $0xab] sm:$0xff]  ;;  %v2693_v38 = vld [vmem:[#allocation2 + $0xb3] sm:$0xff] }
 0x1a3   : > { %7519 = vmatpush3.bf16.msra.mxu0 %v7516_v29  ;;  %7565 = vmatprep.subr.bf16.mxu1 %v7564_v40  ;;  %v799_v29 = vld [vmem:[#allocation2 + $0x88] sm:$0xff]  ;;  %v2690_v37 = vld [vmem:[#allocation2 + $0x9b] sm:$0xff] }
 0x1a4   : > { %7521 = vmatprep.subr.bf16.mxu0 %v7520_v42  ;;  %6847 = vmatmul.mubr.msk.f32.gmra.mrb[90].mxu0 %vm734_vm4, %v789_v49  ;;  %v805_v49 = vld [vmem:[#allocation2 + $0xb8] sm:$0xff] }
 0x1a5   : > { %7081 = vmatmul.mubr.msk.f32.gmra.mrb[4].mxu1 %vm734_vm4, %v2678_v50  ;;  %6849 = vmatprep.mubr.msk.f32.mxu0 %vm734_vm4, %v790_v53  ;;  %v2694_v50 = vld [vmem:[#allocation2 + $0xbb] sm:$0xff] }
 0x1a6   : > { %7083 = vmatprep.mubr.msk.f32.mxu1 %vm734_vm4, %v2679_v59  ;;  %7567 = vmatpush3.bf16.msra.mxu1 %v7564_v40  ;;  %v2691_v40 = vld [vmem:[#allocation2 + $0xa3] sm:$0xff] }
 0x1a7   : > { %7523 = vmatpush3.bf16.msra.mxu0 %v7520_v42  ;;  %7569 = vmatprep.subr.bf16.mxu1 %v7568_v57  ;;  %v803_v42 = vld [vmem:[#allocation2 + $0xa8] sm:$0xff]  ;;  %v806_v53 = vld [vmem:[#allocation2 + $0xc0] sm:$0xff] }
 0x1a8   : > { %6850 = vmatmul.mubr.msk.f32.gmra.mrb[92].mxu0 %vm734_vm4, %v791_v3  ;;  %v807_v59 = vld [vmem:[#allocation2 + $0xc8] sm:$0xff]  ;;  %v2697_v3 = vld [vmem:[#allocation2 + $0xd3] sm:$0xff] }
 0x1a9   : > { %7084 = vmatmul.mubr.msk.f32.gmra.mrb[6].mxu1 %vm734_vm4, %v2680_v4  ;;  %6852 = vmatprep.mubr.msk.f32.mxu0 %vm734_vm4, %v792_v7  ;;  %v809_v4 = vld [vmem:[#allocation2 + $0xd8] sm:$0xff] }
 0x1aa   : > { %7086 = vmatprep.mubr.msk.f32.mxu1 %vm734_vm4, %v2681_v9  ;;  %7571 = vmatpush3.bf16.msra.mxu1 %v7568_v57  ;;  %v2695_v57 = vld [vmem:[#allocation2 + $0xc3] sm:$0xff]  ;;  %v2698_v7 = vld [vmem:[#allocation2 + $0xdb] sm:$0xff] }
 0x1ab   : > { %7573 = vmatprep.subr.bf16.mxu1 %v8627_v6  ;;  %v810_v9 = vld [vmem:[#allocation2 + $0xe0] sm:$0xff] }
 0x1ac   : > { %6853 = vmatmul.mubr.msk.f32.gmra.mrb[94].mxu0 %vm734_vm4, %v793_v11  ;;  %v2699_v11 = vld [vmem:[#allocation2 + $0xe3] sm:$0xff] }
 0x1ad   : > { %7087 = vmatmul.mubr.msk.f32.gmra.mrb[8].mxu1 %vm734_vm4, %v2682_v13  ;;  %6855 = vmatprep.mubr.msk.f32.mxu0 %vm734_vm4, %v794_v14  ;;  %v811_v13 = vld [vmem:[#allocation2 + $0xe8] sm:$0xff] }
 0x1ae   : > { %7089 = vmatprep.mubr.msk.f32.mxu1 %vm734_vm4, %v2683_v15  ;;  %v2700_v14 = vld [vmem:[#allocation2 + $0xeb] sm:$0xff] }
 0x1af   : > { %v812_v15 = vld [vmem:[#allocation2 + $0xf0] sm:$0xff] }
 0x1b0   : > { %6856 = vmatmul.mubr.msk.f32.gmra.mrb[96].mxu0 %vm734_vm4, %v795_v16  ;;  %v2701_v16 = vld [vmem:[#allocation2 + $0xf3] sm:$0xff] }
 0x1b1   : > { %7090 = vmatmul.mubr.msk.f32.gmra.mrb[10].mxu1 %vm734_vm4, %v2684_v19  ;;  %6858 = vmatprep.mubr.msk.f32.mxu0 %vm734_vm4, %v796_v20  ;;  %v813_v19 = vld [vmem:[#allocation2 + $0xf8] sm:$0xff] }
 0x1b2   : > { %7092 = vmatprep.mubr.msk.f32.mxu1 %vm734_vm4, %v2685_v21  ;;  %v2702_v20 = vld [vmem:[#allocation2 + $0xfb] sm:$0xff] }
 0x1b3   : > { %v814_v21 = vld [vmem:[#allocation2 + $0x100] sm:$0xff] }
 0x1b4   : > { %6859 = vmatmul.mubr.msk.f32.gmra.mrb[98].mxu0 %vm734_vm4, %v797_v24  ;;  %v2703_v24 = vld [vmem:[#allocation2 + $0x103] sm:$0xff] }
 0x1b5   : > { %7093 = vmatmul.mubr.msk.f32.gmra.mrb[12].mxu1 %vm734_vm4, %v2686_v25  ;;  %6861 = vmatprep.mubr.msk.f32.mxu0 %vm734_vm4, %v798_v26  ;;  %v815_v25 = vld [vmem:[#allocation2 + $0x108] sm:$0xff] }
 0x1b6   : > { %7095 = vmatprep.mubr.msk.f32.mxu1 %vm734_vm4, %v2687_v27  ;;  %v2704_v26 = vld [vmem:[#allocation2 + $0x10b] sm:$0xff] }
 0x1b7   : > { %v816_v27 = vld [vmem:[#allocation2 + $0x110] sm:$0xff] }
 0x1b8   : > { %6862 = vmatmul.mubr.msk.f32.gmra.mrb[100].mxu0 %vm734_vm4, %v799_v29  ;;  %v2705_v29 = vld [vmem:[#allocation2 + $0x113] sm:$0xff] }
 0x1b9   : > { %7096 = vmatmul.mubr.msk.f32.gmra.mrb[14].mxu1 %vm734_vm4, %v2688_v31  ;;  %6864 = vmatprep.mubr.msk.f32.mxu0 %vm734_vm4, %v800_v35  ;;  %v817_v31 = vld [vmem:[#allocation2 + $0x118] sm:$0xff] }
 0x1ba   : > { %7098 = vmatprep.mubr.msk.f32.mxu1 %vm734_vm4, %v2689_v33  ;;  %v2706_v35 = vld [vmem:[#allocation2 + $0x11b] sm:$0xff] }
 0x1bb   : > { %v818_v33 = vld [vmem:[#allocation2 + $0x120] sm:$0xff] }
 0x1bc   : > { %6865 = vmatmul.mubr.msk.f32.gmra.mrb[102].mxu0 %vm734_vm4, %v801_v34  ;;  %v2707_v34 = vld [vmem:[#allocation2 + $0x123] sm:$0xff] }
 0x1bd   : > { %7099 = vmatmul.mubr.msk.f32.gmra.mrb[16].mxu1 %vm734_vm4, %v2690_v37  ;;  %6867 = vmatprep.mubr.msk.f32.mxu0 %vm734_vm4, %v802_v39  ;;  %v819_v37 = vld [vmem:[#allocation2 + $0x128] sm:$0xff] }
 0x1be   : > { %7101 = vmatprep.mubr.msk.f32.mxu1 %vm734_vm4, %v2691_v40  ;;  %v2708_v39 = vld [vmem:[#allocation2 + $0x12b] sm:$0xff] }
 0x1bf   : > { %v820_v40 = vld [vmem:[#allocation2 + $0x130] sm:$0xff] }
 0x1c0   : > { %6868 = vmatmul.mubr.msk.f32.gmra.mrb[104].mxu0 %vm734_vm4, %v803_v42  ;;  %v2709_v42 = vld [vmem:[#allocation2 + $0x133] sm:$0xff] }
 0x1c1   : > { %7102 = vmatmul.mubr.msk.f32.gmra.mrb[18].mxu1 %vm734_vm4, %v2692_v44  ;;  %6870 = vmatprep.mubr.msk.f32.mxu0 %vm734_vm4, %v804_v47  ;;  %v821_v44 = vld [vmem:[#allocation2 + $0x138] sm:$0xff] }
 0x1c2   : > { %7104 = vmatprep.mubr.msk.f32.mxu1 %vm734_vm4, %v2693_v38  ;;  %v2710_v47 = vld [vmem:[#allocation2 + $0x13b] sm:$0xff] }
 0x1c3   : > { %v822_v38 = vld [vmem:[#allocation2 + $0x140] sm:$0xff] }
 0x1c4   : > { %6871 = vmatmul.mubr.msk.f32.gmra.mrb[106].mxu0 %vm734_vm4, %v805_v49  ;;  %v2711_v49 = vld [vmem:[#allocation2 + $0x143] sm:$0xff] }
 0x1c5   : > { %7105 = vmatmul.mubr.msk.f32.gmra.mrb[20].mxu1 %vm734_vm4, %v2694_v50  ;;  %6873 = vmatprep.mubr.msk.f32.mxu0 %vm734_vm4, %v806_v53  ;;  %v2713_v50 = vld [vmem:[#allocation2 + $0x153] sm:$0xff]  ;;  %v823_v53 = vld [vmem:[#allocation2 + $0x148] sm:$0xff] }
 0x1c6   : > { %7107 = vmatprep.mubr.msk.f32.mxu1 %vm734_vm4, %v2695_v57  ;;  %v2712_v57 = vld [vmem:[#allocation2 + $0x14b] sm:$0xff] }
 0x1c8   : > { %6874 = vmatmul.mubr.msk.f32.gmra.mrb[108].mxu0 %vm734_vm4, %v807_v59  ;;  %v1685_v59 = vld [vmem:[#allocation2 + $0x2] sm:$0xff] }
 0x1c9   : > { %7108 = vmatmul.mubr.msk.f32.gmra.mrb[22].mxu1 %vm734_vm4, %v2696_v62  ;;  %6876 = vmatprep.mubr.msk.f32.mxu0 %vm734_vm4, %v808_v0  ;;  %v2714_v62 = vld [vmem:[#allocation2 + $0x15b] sm:$0xff]  ;;  %v1686_v0 = vld [vmem:[#allocation2 + $0xa] sm:$0xff] }
 0x1ca   : > { %7110 = vmatprep.mubr.msk.f32.mxu1 %vm734_vm4, %v2697_v3  ;;  %v1687_v3 = vld [vmem:[#allocation2 + $0x12] sm:$0xff] }
 0x1cc   : > { %6877 = vmatmul.mubr.msk.f32.gmra.mrb[110].mxu0 %vm734_vm4, %v809_v4  ;;  %v3167_v4 = vld [vmem:[#allocation2 + $0x14] sm:$0xff] }
 0x1cd   : > { %7111 = vmatmul.mubr.msk.f32.gmra.mrb[24].mxu1 %vm734_vm4, %v2698_v7  ;;  %6879 = vmatprep.mubr.msk.f32.mxu0 %vm734_vm4, %v810_v9  ;;  %v5935_v7 = vld [vmem:[%s9432_s2 + $0x190] sm:$0xff]  ;;  %v5936_v9 = vld [vmem:[%s9432_s2 + $0x198] sm:$0xff] }
 0x1ce   : > { %7113 = vmatprep.mubr.msk.f32.mxu1 %vm734_vm4, %v2699_v11  ;;  %v1688_v11 = vld [vmem:[#allocation2 + $0x1a] sm:$0xff] }
 0x1d0   : > { %6880 = vmatmul.mubr.msk.f32.gmra.mrb[112].mxu0 %vm734_vm4, %v811_v13  ;;  %v3168_v13 = vld [vmem:[#allocation2 + $0x1c] sm:$0xff] }
 0x1d1   : > { %7114 = vmatmul.mubr.msk.f32.gmra.mrb[26].mxu1 %vm734_vm4, %v2700_v14  ;;  %6882 = vmatprep.mubr.msk.f32.mxu0 %vm734_vm4, %v812_v15  ;;  %v1689_v14 = vld [vmem:[#allocation2 + $0x22] sm:$0xff]  ;;  %v7576_v15 = vpack.c.bf16 %v5936_v9, %v5935_v7 }
 0x1d2   : > { %7116 = vmatprep.mubr.msk.f32.mxu1 %vm734_vm4, %v2701_v16  ;;  %v8710_v16 = vld [vmem:[#allocation2 + $0x24] sm:$0xff]  ;;  %v8787_v7 = vld [vmem:[#allocation2 + $0x7c] sm:$0xff] }
 0x1d3   : > { %v8793_v9 = vld [vmem:[#allocation2 + $0x84] sm:$0xff] }
 0x1d4   : > { %6883 = vmatmul.mubr.msk.f32.gmra.mrb[114].mxu0 %vm734_vm4, %v813_v19  ;;  %v5937_v19 = vld [vmem:[%s9432_s2 + $0x1a0] sm:$0xff] }
 0x1d5   : > { %7117 = vmatmul.mubr.msk.f32.gmra.mrb[28].mxu1 %vm734_vm4, %v2702_v20  ;;  %6885 = vmatprep.mubr.msk.f32.mxu0 %vm734_vm4, %v814_v21  ;;  %v5938_v20 = vld [vmem:[%s9432_s2 + $0x1a8] sm:$0xff] }
 0x1d6   : > { %7119 = vmatprep.mubr.msk.f32.mxu1 %vm734_vm4, %v2703_v24  ;;  %v1690_v21 = vld [vmem:[#allocation2 + $0x2a] sm:$0xff] }
 0x1d7   : > { %v8722_v24 = vld [vmem:[#allocation2 + $0x2c] sm:$0xff] }
 0x1d8   : > { %6886 = vmatmul.mubr.msk.f32.gmra.mrb[116].mxu0 %vm734_vm4, %v815_v25  ;;  %v1691_v25 = vld [vmem:[#allocation2 + $0x32] sm:$0xff] }
 0x1d9   : > { %7120 = vmatmul.mubr.msk.f32.gmra.mrb[30].mxu1 %vm734_vm4, %v2704_v26  ;;  %6888 = vmatprep.mubr.msk.f32.mxu0 %vm734_vm4, %v816_v27  ;;  %v7580_v26 = vpack.c.bf16 %v5938_v20, %v5937_v19  ;;  %v8727_v27 = vld [vmem:[#allocation2 + $0x34] sm:$0xff]  ;;  %v5988_v19 = vld [vmem:[%s9432_s2 + $0x1e8] sm:$0xff] }
 0x1da   : > { %7122 = vmatprep.mubr.msk.f32.mxu1 %vm734_vm4, %v2705_v29  ;;  %v5939_v29 = vld [vmem:[%s9432_s2 + $0x1b0] sm:$0xff] }
 0x1dc   : > { %6889 = vmatmul.mubr.msk.f32.gmra.mrb[118].mxu0 %vm734_vm4, %v817_v31  ;;  %v1692_v31 = vld [vmem:[#allocation2 + $0x3a] sm:$0xff] }
 0x1dd   : > { %7123 = vmatmul.mubr.msk.f32.gmra.mrb[32].mxu1 %vm734_vm4, %v2706_v35  ;;  %6891 = vmatprep.mubr.msk.f32.mxu0 %vm734_vm4, %v818_v33  ;;  %v8738_v35 = vld [vmem:[#allocation2 + $0x3c] sm:$0xff] }
 0x1de   : > { %7125 = vmatprep.mubr.msk.f32.mxu1 %vm734_vm4, %v2707_v34  ;;  %v1693_v33 = vld [vmem:[#allocation2 + $0x42] sm:$0xff] }
 0x1e0   : > { %6892 = vmatmul.mubr.msk.f32.gmra.mrb[120].mxu0 %vm734_vm4, %v819_v37  ;;  %v8743_v37 = vld [vmem:[#allocation2 + $0x44] sm:$0xff] }
 0x1e1   : > { %7126 = vmatmul.mubr.msk.f32.gmra.mrb[34].mxu1 %vm734_vm4, %v2708_v39  ;;  %6894 = vmatprep.mubr.msk.f32.mxu0 %vm734_vm4, %v820_v40  ;;  %v5983_v39 = vld [vmem:[%s9432_s2 + $0x1c0] sm:$0xff]  ;;  %v5984_v40 = vld [vmem:[%s9432_s2 + $0x1c8] sm:$0xff] }
 0x1e2   : > { %7128 = vmatprep.mubr.msk.f32.mxu1 %vm734_vm4, %v2709_v42  ;;  %v1694_v42 = vld [vmem:[#allocation2 + $0x4a] sm:$0xff] }
 0x1e4   : > { %6895 = vmatmul.mubr.msk.f32.gmra.mrb[122].mxu0 %vm734_vm4, %v821_v44  ;;  %v8754_v44 = vld [vmem:[#allocation2 + $0x4c] sm:$0xff] }
 0x1e5   : > { %7129 = vmatmul.mubr.msk.f32.gmra.mrb[36].mxu1 %vm734_vm4, %v2710_v47  ;;  %6897 = vmatprep.mubr.msk.f32.mxu0 %vm734_vm4, %v822_v38  ;;  %v8756_v47 = vpack.c.bf16 %v5984_v40, %v5983_v39  ;;  %v1695_v38 = vld [vmem:[#allocation2 + $0x52] sm:$0xff]  ;;  %v6037_v39 = vld [vmem:[%s9432_s2 + $0x220] sm:$0xff]  ;;  %v6038_v40 = vld [vmem:[%s9432_s2 + $0x228] sm:$0xff] }
 0x1e6   : > { %7131 = vmatprep.mubr.msk.f32.mxu1 %vm734_vm4, %v2711_v49  ;;  %v8761_v49 = vld [vmem:[#allocation2 + $0x54] sm:$0xff] }
 0x1e8   : > { %6898 = vmatmul.mubr.msk.f32.gmra.mrb[124].mxu0 %vm734_vm4, %v823_v53  ;;  %v8766_v53 = vld [vmem:[#allocation2 + $0x5c] sm:$0xff] }
 0x1e9   : > { %7132 = vmatmul.mubr.msk.f32.gmra.mrb[38].mxu1 %vm734_vm4, %v2712_v57  ;;  %6916 = vmatprep.mubr.msk.f32.mxu0 %vm734_vm4, %v1685_v59  ;;  %v1697_v57 = vld [vmem:[#allocation2 + $0x62] sm:$0xff] }
 0x1ea   : > { %7134 = vmatprep.mubr.msk.f32.mxu1 %vm734_vm4, %v2713_v50  ;;  %v1696_v50 = vld [vmem:[#allocation2 + $0x5a] sm:$0xff]  ;;  %v8772_v59 = vld [vmem:[#allocation2 + $0x64] sm:$0xff] }
 0x1ec   : > { %6917 = vmatmul.mubr.msk.f32.vlgmr.msra.gmra.mrb[84].mxu0 %vm734_vm4, %v1686_v0  ;;  %v8777_v0 = vld [vmem:[#allocation2 + $0x6c] sm:$0xff] }
 0x1ed   : > { %7135 = vmatmul.mubr.msk.f32.gmra.mrb[40].mxu1 %vm734_vm4, %v2714_v62  ;;  %6919 = vmatprep.mubr.msk.f32.mxu0 %vm734_vm4, %v1687_v3  ;;  %v1698_v62 = vld [vmem:[#allocation2 + $0x6a] sm:$0xff]  ;;  %v1699_v3 = vld [vmem:[#allocation2 + $0x72] sm:$0xff] }
 0x1ee   : > { %7153 = vmatprep.mubr.msk.f32.mxu1 %vm734_vm4, %v3167_v4  ;;  %v8782_v4 = vld [vmem:[#allocation2 + $0x74] sm:$0xff] }
 0x1f0   : > { %6920 = vmatmul.mubr.msk.f32.gmra.mrb[86].mxu0 %vm734_vm4, %v1688_v11  ;;  %v8799_v11 = vld [vmem:[#allocation2 + $0x8c] sm:$0xff] }
 0x1f1   : > { %7154 = vmatmul.mubr.msk.f32.vlgmr.msra.gmra.mrb[0].mxu1 %vm734_vm4, %v3168_v13  ;;  %6922 = vmatprep.mubr.msk.f32.mxu0 %vm734_vm4, %v1689_v14  ;;  %v8945_v13 = vld [vmem:[#allocation2 + $0x14c] sm:$0xff]  ;;  %v5986_v14 = vld [vmem:[%s9432_s2 + $0x1d8] sm:$0xff] }
 0x1f2   : > { %7156 = vmatprep.mubr.msk.f32.mxu1 %vm734_vm4, %v8710_v16  ;;  %7575 = vmatpush3.bf16.msra.mxu1 %v8627_v6  ;;  %v5940_v6 = vld [vmem:[%s9432_s2 + $0x1b8] sm:$0xff] }
 0x1f3   : > { %7577 = vmatprep.subr.bf16.mxu1 %v7576_v15  ;;  %v7584_v34 = vpack.c.bf16 %v5940_v6, %v5939_v29  ;;  %v3701_v29 = vld [vmem:[#allocation2 + $0x164] sm:$0xff]  ;;  %v3702_v6 = vld [vmem:[#allocation2 + $0x16c] sm:$0xff] }
 0x1f4   : > { %6923 = vmatmul.mubr.msk.f32.gmra.mrb[88].mxu0 %vm734_vm4, %v1690_v21  ;;  %v5990_v21 = vld [vmem:[%s9432_s2 + $0x1f8] sm:$0xff] }
 0x1f5   : > { %7157 = vmatmul.mubr.msk.f32.gmra.mrb[2].mxu1 %vm734_vm4, %v8722_v24  ;;  %6925 = vmatprep.mubr.msk.f32.mxu0 %vm734_vm4, %v1691_v25  ;;  %v6033_v25 = vld [vmem:[%s9432_s2 + $0x200] sm:$0xff] }
 0x1f6   : > { %7159 = vmatprep.mubr.msk.f32.mxu1 %vm734_vm4, %v8727_v27  ;;  %7579 = vmatpush3.bf16.msra.mxu1 %v7576_v15  ;;  %v5987_v15 = vld [vmem:[%s9432_s2 + $0x1e0] sm:$0xff] }
 0x1f7   : > { %7581 = vmatprep.subr.bf16.mxu1 %v7580_v26  ;;  %v7596_v20 = vpack.c.bf16 %v5988_v19, %v5987_v15  ;;  %v4187_v19 = vld [vmem:[#allocation2 + $0x125] sm:$0xff] }
 0x1f8   : > { %6926 = vmatmul.mubr.msk.f32.gmra.mrb[90].mxu0 %vm734_vm4, %v1692_v31  ;;  %v6035_v31 = vld [vmem:[%s9432_s2 + $0x210] sm:$0xff] }
 0x1f9   : > { %7160 = vmatmul.mubr.msk.f32.gmra.mrb[4].mxu1 %vm734_vm4, %v8738_v35  ;;  %6928 = vmatprep.mubr.msk.f32.mxu0 %vm734_vm4, %v1693_v33  ;;  %v4155_v33 = vld [vmem:[#allocation2 + $0x25] sm:$0xff] }
 0x1fa   : > { %7162 = vmatprep.mubr.msk.f32.mxu1 %vm734_vm4, %v8743_v37  ;;  %7583 = vmatpush3.bf16.msra.mxu1 %v7580_v26  ;;  %v6034_v26 = vld [vmem:[%s9432_s2 + $0x208] sm:$0xff] }
 0x1fb   : > { %7585 = vmatprep.subr.bf16.mxu1 %v7584_v34 }
 0x1fc   : > { %6929 = vmatmul.mubr.msk.f32.gmra.mrb[92].mxu0 %vm734_vm4, %v1694_v42  ;;  %v4157_v42 = vld [vmem:[#allocation2 + $0x35] sm:$0xff] }
 0x1fd   : > { %7163 = vmatmul.mubr.msk.f32.gmra.mrb[6].mxu1 %vm734_vm4, %v8754_v44  ;;  %6931 = vmatprep.mubr.msk.f32.mxu0 %vm734_vm4, %v1695_v38  ;;  %v6039_v38 = vld [vmem:[%s9432_s2 + $0x230] sm:$0xff] }
 0x1fe   : > { %7165 = vmatprep.mubr.msk.f32.mxu1 %vm734_vm4, %v8761_v49  ;;  %7587 = vmatpush3.bf16.msra.mxu1 %v7584_v34 }
 0x1ff   : > { %7589 = vmatprep.subr.bf16.mxu1 %v8756_v47 }
 0x200   : > { %6932 = vmatmul.mubr.msk.f32.gmra.mrb[94].mxu0 %vm734_vm4, %v1696_v50  ;;  %v4159_v50 = vld [vmem:[#allocation2 + $0x45] sm:$0xff] }
 0x201   : > { %7166 = vmatmul.mubr.msk.f32.gmra.mrb[8].mxu1 %vm734_vm4, %v8766_v53  ;;  %6934 = vmatprep.mubr.msk.f32.mxu0 %vm734_vm4, %v1697_v57  ;;  %v4160_v57 = vld [vmem:[#allocation2 + $0x4d] sm:$0xff] }
 0x202   : > { %7168 = vmatprep.mubr.msk.f32.mxu1 %vm734_vm4, %v8772_v59 }
 0x204   : > { %6935 = vmatmul.mubr.msk.f32.gmra.mrb[96].mxu0 %vm734_vm4, %v1698_v62  ;;  %v4162_v62 = vld [vmem:[#allocation2 + $0x5d] sm:$0xff] }
 0x205   : > { %7169 = vmatmul.mubr.msk.f32.gmra.mrb[10].mxu1 %vm734_vm4, %v8777_v0  ;;  %6937 = vmatprep.mubr.msk.f32.mxu0 %vm734_vm4, %v1699_v3  ;;  %v4164_v3 = vld [vmem:[#allocation2 + $0x6d] sm:$0xff] }
 0x206   : > { %7171 = vmatprep.mubr.msk.f32.mxu1 %vm734_vm4, %v8782_v4 }
 0x208   : > { %6938 = vmatmul.mubr.msk.f32.gmra.mrb[98].mxu0 %vm734_vm4, %v8396_v41  ;;  %v8805_v41 = vld [vmem:[#allocation2 + $0x94] sm:$0xff] }
 0x209   : > { %7172 = vmatmul.mubr.msk.f32.gmra.mrb[12].mxu1 %vm734_vm4, %v8787_v7  ;;  %6940 = vmatprep.mubr.msk.f32.mxu0 %vm734_vm4, %v8402_v45  ;;  %v8811_v45 = vld [vmem:[#allocation2 + $0x9c] sm:$0xff] }
 0x20a   : > { %7174 = vmatprep.mubr.msk.f32.mxu1 %vm734_vm4, %v8793_v9 }
 0x20c   : > { %6941 = vmatmul.mubr.msk.f32.gmra.mrb[100].mxu0 %vm734_vm4, %v8409_v51  ;;  %v8817_v51 = vld [vmem:[#allocation2 + $0xa4] sm:$0xff] }
 0x20d   : > { %7175 = vmatmul.mubr.msk.f32.gmra.mrb[14].mxu1 %vm734_vm4, %v8799_v11  ;;  %6943 = vmatprep.mubr.msk.f32.mxu0 %vm734_vm4, %v8415_v55  ;;  %v8823_v55 = vld [vmem:[#allocation2 + $0xac] sm:$0xff] }
 0x20e   : > { %7177 = vmatprep.mubr.msk.f32.mxu1 %vm734_vm4, %v8805_v41 }
 0x210   : > { %6944 = vmatmul.mubr.msk.f32.gmra.mrb[102].mxu0 %vm734_vm4, %v8421_v61  ;;  %v8829_v61 = vld [vmem:[#allocation2 + $0xb4] sm:$0xff] }
 0x211   : > { %7178 = vmatmul.mubr.msk.f32.gmra.mrb[16].mxu1 %vm734_vm4, %v8811_v45  ;;  %6946 = vmatprep.mubr.msk.f32.mxu0 %vm734_vm4, %v8427_v2  ;;  %v8835_v2 = vld [vmem:[#allocation2 + $0xbc] sm:$0xff] }
 0x212   : > { %7180 = vmatprep.mubr.msk.f32.mxu1 %vm734_vm4, %v8817_v51 }
 0x214   : > { %6947 = vmatmul.mubr.msk.f32.gmra.mrb[104].mxu0 %vm734_vm4, %v8433_v8  ;;  %v8841_v8 = vld [vmem:[#allocation2 + $0xc4] sm:$0xff] }
 0x215   : > { %7181 = vmatmul.mubr.msk.f32.gmra.mrb[18].mxu1 %vm734_vm4, %v8823_v55  ;;  %6949 = vmatprep.mubr.msk.f32.mxu0 %vm734_vm4, %v8439_v12  ;;  %v8847_v12 = vld [vmem:[#allocation2 + $0xcc] sm:$0xff] }
 0x216   : > { %7183 = vmatprep.mubr.msk.f32.mxu1 %vm734_vm4, %v8829_v61 }
 0x218   : > { %6950 = vmatmul.mubr.msk.f32.gmra.mrb[106].mxu0 %vm734_vm4, %v8445_v18  ;;  %v8853_v18 = vld [vmem:[#allocation2 + $0xd4] sm:$0xff] }
 0x219   : > { %7184 = vmatmul.mubr.msk.f32.gmra.mrb[20].mxu1 %vm734_vm4, %v8835_v2  ;;  %6952 = vmatprep.mubr.msk.f32.mxu0 %vm734_vm4, %v8451_v22  ;;  %v8859_v22 = vld [vmem:[#allocation2 + $0xdc] sm:$0xff] }
 0x21a   : > { %7186 = vmatprep.mubr.msk.f32.mxu1 %vm734_vm4, %v8841_v8 }
 0x21c   : > { %6953 = vmatmul.mubr.msk.f32.gmra.mrb[108].mxu0 %vm734_vm4, %v8457_v28  ;;  %v8865_v28 = vld [vmem:[#allocation2 + $0xe4] sm:$0xff] }
 0x21d   : > { %7187 = vmatmul.mubr.msk.f32.gmra.mrb[22].mxu1 %vm734_vm4, %v8847_v12  ;;  %6955 = vmatprep.mubr.msk.f32.mxu0 %vm734_vm4, %v8463_v32  ;;  %v8871_v32 = vld [vmem:[#allocation2 + $0xec] sm:$0xff] }
 0x21e   : > { %7189 = vmatprep.mubr.msk.f32.mxu1 %vm734_vm4, %v8853_v18 }
 0x220   : > { %6956 = vmatmul.mubr.msk.f32.gmra.mrb[110].mxu0 %vm734_vm4, %v8478_v43  ;;  %v8877_v43 = vld [vmem:[#allocation2 + $0xf4] sm:$0xff] }
 0x221   : > { %7190 = vmatmul.mubr.msk.f32.gmra.mrb[24].mxu1 %vm734_vm4, %v8859_v22  ;;  %6958 = vmatprep.mubr.msk.f32.mxu0 %vm734_vm4, %v8484_v48  ;;  %v8883_v48 = vld [vmem:[#allocation2 + $0xfc] sm:$0xff] }
 0x222   : > { %7192 = vmatprep.mubr.msk.f32.mxu1 %vm734_vm4, %v8865_v28 }
 0x224   : > { %6959 = vmatmul.mubr.msk.f32.gmra.mrb[112].mxu0 %vm734_vm4, %v8490_v56  ;;  %v8889_v56 = vld [vmem:[#allocation2 + $0x104] sm:$0xff] }
 0x225   : > { %7193 = vmatmul.mubr.msk.f32.gmra.mrb[26].mxu1 %vm734_vm4, %v8871_v32  ;;  %6961 = vmatprep.mubr.msk.f32.mxu0 %vm734_vm4, %v8496_v60  ;;  %v8895_v60 = vld [vmem:[#allocation2 + $0x10c] sm:$0xff] }
 0x226   : > { %7195 = vmatprep.mubr.msk.f32.mxu1 %vm734_vm4, %v8877_v43 }
 0x228   : > { %6962 = vmatmul.mubr.msk.f32.gmra.mrb[114].mxu0 %vm734_vm4, %v8502_v5  ;;  %v8901_v5 = vld [vmem:[#allocation2 + $0x114] sm:$0xff] }
 0x229   : > { %7196 = vmatmul.mubr.msk.f32.gmra.mrb[28].mxu1 %vm734_vm4, %v8883_v48  ;;  %6964 = vmatprep.mubr.msk.f32.mxu0 %vm734_vm4, %v8508_v10  ;;  %v8907_v10 = vld [vmem:[#allocation2 + $0x11c] sm:$0xff] }
 0x22a   : > { %7198 = vmatprep.mubr.msk.f32.mxu1 %vm734_vm4, %v8889_v56 }
 0x22c   : > { %6965 = vmatmul.mubr.msk.f32.gmra.mrb[116].mxu0 %vm734_vm4, %v8514_v17  ;;  %v8913_v17 = vld [vmem:[#allocation2 + $0x124] sm:$0xff] }
 0x22d   : > { %7199 = vmatmul.mubr.msk.f32.gmra.mrb[30].mxu1 %vm734_vm4, %v8895_v60  ;;  %6967 = vmatprep.mubr.msk.f32.mxu0 %vm734_vm4, %v8520_v23  ;;  %v8919_v23 = vld [vmem:[#allocation2 + $0x12c] sm:$0xff] }
 0x22e   : > { %7201 = vmatprep.mubr.msk.f32.mxu1 %vm734_vm4, %v8901_v5 }
 0x230   : > { %6968 = vmatmul.mubr.msk.f32.gmra.mrb[118].mxu0 %vm734_vm4, %v8526_v30  ;;  %v8925_v30 = vld [vmem:[#allocation2 + $0x134] sm:$0xff] }
 0x231   : > { %7202 = vmatmul.mubr.msk.f32.gmra.mrb[32].mxu1 %vm734_vm4, %v8907_v10  ;;  %6970 = vmatprep.mubr.msk.f32.mxu0 %vm734_vm4, %v8532_v36  ;;  %v8931_v36 = vld [vmem:[#allocation2 + $0x13c] sm:$0xff] }
 0x232   : > { %7204 = vmatprep.mubr.msk.f32.mxu1 %vm734_vm4, %v8913_v17 }
 0x234   : > { %6971 = vmatmul.mubr.msk.f32.gmra.mrb[120].mxu0 %vm734_vm4, %v8538_v46  ;;  %v8937_v46 = vld [vmem:[#allocation2 + $0x144] sm:$0xff] }
 0x235   : > { %7205 = vmatmul.mubr.msk.f32.gmra.mrb[34].mxu1 %vm734_vm4, %v8919_v23  ;;  %6973 = vmatprep.mubr.msk.f32.mxu0 %vm734_vm4, %v8544_v52  ;;  %v8943_v52 = vld [vmem:[#allocation2 + $0x154] sm:$0xff] }
 0x236   : > { %7207 = vmatprep.mubr.msk.f32.mxu1 %vm734_vm4, %v8925_v30 }
 0x238   : > { %6974 = vmatmul.mubr.msk.f32.gmra.mrb[122].mxu0 %vm734_vm4, %v8550_v54  ;;  %v3208_v54 = vld [vmem:[#allocation2 + $0x15c] sm:$0xff] }
 0x239   : > { %7208 = vmatmul.mubr.msk.f32.gmra.mrb[36].mxu1 %vm734_vm4, %v8931_v36  ;;  %6976 = vmatprep.mubr.msk.f32.mxu0 %vm734_vm4, %v8555_v58  ;;  %v5985_v58 = vld [vmem:[%s9432_s2 + $0x1d0] sm:$0xff] }
 0x23a   : > { %7210 = vmatprep.mubr.msk.f32.mxu1 %vm734_vm4, %v8937_v46 }
 0x23c   : > { %6977 = vmatmul.mubr.msk.f32.gmra.mrb[124].mxu0 %vm734_vm4, %v8560_v63  ;;  %v7592_v63 = vpack.c.bf16 %v5986_v14, %v5985_v58  ;;  %v4185_v58 = vld [vmem:[#allocation2 + $0x115] sm:$0xff] }
 0x23d   : > { %7211 = vmatmul.mubr.msk.f32.gmra.mrb[38].mxu1 %vm734_vm4, %v8945_v13 }
 0x23e   : > { %7213 = vmatprep.mubr.msk.f32.mxu1 %vm734_vm4, %v8943_v52 }
 0x241   : > { %7214 = vmatmul.mubr.msk.f32.gmra.mrb[40].mxu1 %vm734_vm4, %v3208_v54 }
 0x242   : > { %7232 = vmatprep.mubr.msk.f32.mxu1 %vm734_vm4, %v8710_v16  ;;  %v5989_v16 = vld [vmem:[%s9432_s2 + $0x1f0] sm:$0xff] }
 0x245   : > { %7233 = vmatmul.mubr.msk.f32.vlgmr.msra.gmra.mrb[0].mxu1 %vm734_vm4, %v8722_v24  ;;  %v7600_v24 = vpack.c.bf16 %v5990_v21, %v5989_v16  ;;  %v4188_v16 = vld [vmem:[#allocation2 + $0x12d] sm:$0xff] }
 0x246   : > { %7235 = vmatprep.mubr.msk.f32.mxu1 %vm734_vm4, %v8727_v27  ;;  %7591 = vmatpush3.bf16.msra.mxu1 %v8756_v47  ;;  %v7604_v27 = vpack.c.bf16 %v6034_v26, %v6033_v25  ;;  %v4158_v47 = vld [vmem:[#allocation2 + $0x3d] sm:$0xff] }
 0x247   : > { %7593 = vmatprep.subr.bf16.mxu1 %v7592_v63  ;;  %v4190_v26 = vld [vmem:[#allocation2 + $0x13d] sm:$0xff] }
 0x249   : > { %7236 = vmatmul.mubr.msk.f32.gmra.mrb[2].mxu1 %vm734_vm4, %v8738_v35  ;;  %v6036_v35 = vld [vmem:[%s9432_s2 + $0x218] sm:$0xff] }
 0x24a   : > { %7238 = vmatprep.mubr.msk.f32.mxu1 %vm734_vm4, %v8743_v37  ;;  %7595 = vmatpush3.bf16.msra.mxu1 %v7592_v63  ;;  %v7608_v34 = vpack.c.bf16 %v6036_v35, %v6035_v31  ;;  %v4156_v37 = vld [vmem:[#allocation2 + $0x2d] sm:$0xff]  ;;  %v4186_v63 = vld [vmem:[#allocation2 + $0x11d] sm:$0xff] }
 0x24b   : > { %7597 = vmatprep.subr.bf16.mxu1 %v7596_v20  ;;  %v4192_v35 = vld [vmem:[#allocation2 + $0x14d] sm:$0xff] }
 0x24d   : > { %7239 = vmatmul.mubr.msk.f32.gmra.mrb[4].mxu1 %vm734_vm4, %v8754_v44  ;;  %v7612_v44 = vpack.c.bf16 %v6038_v40, %v6037_v39 }
 0x24e   : > { %7241 = vmatprep.mubr.msk.f32.mxu1 %vm734_vm4, %v8761_v49  ;;  %7599 = vmatpush3.bf16.msra.mxu1 %v7596_v20  ;;  %v6040_v49 = vld [vmem:[%s9432_s2 + $0x238] sm:$0xff] }
 0x24f   : > { %7601 = vmatprep.subr.bf16.mxu1 %v7600_v24 }
 0x251   : > { %7242 = vmatmul.mubr.msk.f32.gmra.mrb[6].mxu1 %vm734_vm4, %v8766_v53  ;;  %v7616_v53 = vpack.c.bf16 %v6040_v49, %v6039_v38  ;;  %v4649_v38 = vld [vmem:[#allocation2 + $0x26] sm:$0xff] }
 0x252   : > { %7244 = vmatprep.mubr.msk.f32.mxu1 %vm734_vm4, %v8772_v59  ;;  %7603 = vmatpush3.bf16.msra.mxu1 %v7600_v24  ;;  %v4161_v59 = vld [vmem:[#allocation2 + $0x55] sm:$0xff] }
 0x253   : > { %7605 = vmatprep.subr.bf16.mxu1 %v7604_v27  ;;  %v4189_v24 = vld [vmem:[#allocation2 + $0x135] sm:$0xff] }
 0x255   : > { %7245 = vmatmul.mubr.msk.f32.gmra.mrb[8].mxu1 %vm734_vm4, %v8777_v0  ;;  %v4163_v0 = vld [vmem:[#allocation2 + $0x65] sm:$0xff] }
 0x256   : > { %7247 = vmatprep.mubr.msk.f32.mxu1 %vm734_vm4, %v8782_v4  ;;  %v4165_v4 = vld [vmem:[#allocation2 + $0x75] sm:$0xff] }
 0x259   : > { %7248 = vmatmul.mubr.msk.f32.gmra.mrb[10].mxu1 %vm734_vm4, %v8787_v7  ;;  %v4166_v7 = vld [vmem:[#allocation2 + $0x7d] sm:$0xff] }
 0x25a   : > { %7250 = vmatprep.mubr.msk.f32.mxu1 %vm734_vm4, %v8793_v9  ;;  %v4167_v9 = vld [vmem:[#allocation2 + $0x85] sm:$0xff] }
 0x25d   : > { %7251 = vmatmul.mubr.msk.f32.gmra.mrb[12].mxu1 %vm734_vm4, %v8799_v11  ;;  %v4168_v11 = vld [vmem:[#allocation2 + $0x8d] sm:$0xff] }
 0x25e   : > { %7253 = vmatprep.mubr.msk.f32.mxu1 %vm734_vm4, %v8805_v41  ;;  %v4169_v41 = vld [vmem:[#allocation2 + $0x95] sm:$0xff] }
 0x261   : > { %7254 = vmatmul.mubr.msk.f32.gmra.mrb[14].mxu1 %vm734_vm4, %v8811_v45  ;;  %v4170_v45 = vld [vmem:[#allocation2 + $0x9d] sm:$0xff] }
 0x262   : > { %7256 = vmatprep.mubr.msk.f32.mxu1 %vm734_vm4, %v8817_v51  ;;  %v4171_v51 = vld [vmem:[#allocation2 + $0xa5] sm:$0xff] }
 0x265   : > { %7257 = vmatmul.mubr.msk.f32.gmra.mrb[16].mxu1 %vm734_vm4, %v8823_v55  ;;  %v4172_v55 = vld [vmem:[#allocation2 + $0xad] sm:$0xff] }
 0x266   : > { %7259 = vmatprep.mubr.msk.f32.mxu1 %vm734_vm4, %v8829_v61  ;;  %v4173_v61 = vld [vmem:[#allocation2 + $0xb5] sm:$0xff] }
 0x269   : > { %7260 = vmatmul.mubr.msk.f32.gmra.mrb[18].mxu1 %vm734_vm4, %v8835_v2  ;;  %v4174_v2 = vld [vmem:[#allocation2 + $0xbd] sm:$0xff] }
 0x26a   : > { %7262 = vmatprep.mubr.msk.f32.mxu1 %vm734_vm4, %v8841_v8  ;;  %v4175_v8 = vld [vmem:[#allocation2 + $0xc5] sm:$0xff] }
 0x26d   : > { %7263 = vmatmul.mubr.msk.f32.gmra.mrb[20].mxu1 %vm734_vm4, %v8847_v12 }
 0x26e   : > { %7265 = vmatprep.mubr.msk.f32.mxu1 %vm734_vm4, %v8853_v18  ;;  %v4176_v18 = vld [vmem:[#allocation2 + $0xcd] sm:$0xff] }
 0x271   : > { %7266 = vmatmul.mubr.msk.f32.gmra.mrb[22].mxu1 %vm734_vm4, %v8859_v22 }
 0x272   : > { %7268 = vmatprep.mubr.msk.f32.mxu1 %vm734_vm4, %v8865_v28  ;;  %v4177_v28 = vld [vmem:[#allocation2 + $0xd5] sm:$0xff] }
 0x275   : > { %7269 = vmatmul.mubr.msk.f32.gmra.mrb[24].mxu1 %vm734_vm4, %v8871_v32 }
 0x276   : > { %7271 = vmatprep.mubr.msk.f32.mxu1 %vm734_vm4, %v8877_v43  ;;  %v4178_v43 = vld [vmem:[#allocation2 + $0xdd] sm:$0xff] }
 0x279   : > { %7272 = vmatmul.mubr.msk.f32.gmra.mrb[26].mxu1 %vm734_vm4, %v8883_v48 }
 0x27a   : > { %7274 = vmatprep.mubr.msk.f32.mxu1 %vm734_vm4, %v8889_v56  ;;  %v4179_v56 = vld [vmem:[#allocation2 + $0xe5] sm:$0xff] }
 0x27d   : > { %7275 = vmatmul.mubr.msk.f32.gmra.mrb[28].mxu1 %vm734_vm4, %v8895_v60 }
 0x27e   : > { %7277 = vmatprep.mubr.msk.f32.mxu1 %vm734_vm4, %v8901_v5  ;;  %v4180_v5 = vld [vmem:[#allocation2 + $0xed] sm:$0xff] }
 0x281   : > { %7278 = vmatmul.mubr.msk.f32.gmra.mrb[30].mxu1 %vm734_vm4, %v8907_v10 }
 0x282   : > { %7280 = vmatprep.mubr.msk.f32.mxu1 %vm734_vm4, %v8913_v17  ;;  %v4181_v17 = vld [vmem:[#allocation2 + $0xf5] sm:$0xff] }
 0x285   : > { %7281 = vmatmul.mubr.msk.f32.gmra.mrb[32].mxu1 %vm734_vm4, %v8919_v23 }
 0x286   : > { %7283 = vmatprep.mubr.msk.f32.mxu1 %vm734_vm4, %v8925_v30  ;;  %v4182_v30 = vld [vmem:[#allocation2 + $0xfd] sm:$0xff] }
 0x289   : > { %7284 = vmatmul.mubr.msk.f32.gmra.mrb[34].mxu1 %vm734_vm4, %v8931_v36 }
 0x28a   : > { %7286 = vmatprep.mubr.msk.f32.mxu1 %vm734_vm4, %v8937_v46  ;;  %v4183_v46 = vld [vmem:[#allocation2 + $0x105] sm:$0xff] }
 0x28d   : > { %7287 = vmatmul.mubr.msk.f32.gmra.mrb[36].mxu1 %vm734_vm4, %v8945_v13  ;;  %v4184_v13 = vld [vmem:[#allocation2 + $0x10d] sm:$0xff] }
 0x28e   : > { %7289 = vmatprep.mubr.msk.f32.mxu1 %vm734_vm4, %v8943_v52 }
 0x291   : > { %7290 = vmatmul.mubr.msk.f32.gmra.mrb[38].mxu1 %vm734_vm4, %v3208_v54 }
 0x292   : > { %7292 = vmatprep.mubr.msk.f32.mxu1 %vm734_vm4, %v3701_v29  ;;  %v4191_v29 = vld [vmem:[#allocation2 + $0x145] sm:$0xff] }
 0x295   : > { %7293 = vmatmul.mubr.msk.f32.gmra.mrb[40].mxu1 %vm734_vm4, %v3702_v6  ;;  %v4193_v6 = vld [vmem:[#allocation2 + $0x155] sm:$0xff] }
 0x296   : > { %7311 = vmatprep.mubr.msk.f32.mxu1 %vm734_vm4, %v4155_v33 }
 0x299   : > { %7312 = vmatmul.mubr.msk.f32.vlgmr.msra.gmra.mrb[0].mxu1 %vm734_vm4, %v4156_v37  ;;  %v4195_v37 = vld [vmem:[#allocation2 + $0x165] sm:$0xff] }
 0x29a   : > { %7314 = vmatprep.mubr.msk.f32.mxu1 %vm734_vm4, %v4157_v42  ;;  %7607 = vmatpush3.bf16.msra.mxu1 %v7604_v27  ;;  %v4196_v42 = vld [vmem:[#allocation2 + $0x16d] sm:$0xff] }
 0x29b   : > { %7609 = vmatprep.subr.bf16.mxu1 %v7608_v34 }
 0x29d   : > { %7315 = vmatmul.mubr.msk.f32.gmra.mrb[2].mxu1 %vm734_vm4, %v4158_v47 }
 0x29e   : > { %7317 = vmatprep.mubr.msk.f32.mxu1 %vm734_vm4, %v4159_v50  ;;  %7611 = vmatpush3.bf16.msra.mxu1 %v7608_v34  ;;  %v4194_v34 = vld [vmem:[#allocation2 + $0x15d] sm:$0xff]  ;;  %v4650_v50 = vld [vmem:[#allocation2 + $0x2e] sm:$0xff] }
 0x29f   : > { %7613 = vmatprep.subr.bf16.mxu1 %v7612_v44 }
 0x2a1   : > { %7318 = vmatmul.mubr.msk.f32.gmra.mrb[4].mxu1 %vm734_vm4, %v4160_v57  ;;  %v4651_v57 = vld [vmem:[#allocation2 + $0x36] sm:$0xff] }
 0x2a2   : > { %7320 = vmatprep.mubr.msk.f32.mxu1 %vm734_vm4, %v4161_v59  ;;  %7615 = vmatpush3.bf16.msra.mxu1 %v7612_v44 }
 0x2a3   : > { %7617 = vmatprep.subr.bf16.mxu1 %v7616_v53 }
 0x2a5   : > { %7321 = vmatmul.mubr.msk.f32.gmra.mrb[6].mxu1 %vm734_vm4, %v4162_v62  ;;  %v4652_v62 = vld [vmem:[#allocation2 + $0x3e] sm:$0xff] }
 0x2a6   : > { %7323 = vmatprep.mubr.msk.f32.mxu1 %vm734_vm4, %v4163_v0  ;;  %7619 = vmatpush3.bf16.msra.mxu1 %v7616_v53 }
 0x2a9   : > { %7324 = vmatmul.mubr.msk.f32.gmra.mrb[8].mxu1 %vm734_vm4, %v4164_v3  ;;  %v4653_v3 = vld [vmem:[#allocation2 + $0x46] sm:$0xff] }
 0x2aa   : > { %7326 = vmatprep.mubr.msk.f32.mxu1 %vm734_vm4, %v4165_v4 }
 0x2ad   : > { %7327 = vmatmul.mubr.msk.f32.gmra.mrb[10].mxu1 %vm734_vm4, %v4166_v7  ;;  %v4654_v7 = vld [vmem:[#allocation2 + $0x4e] sm:$0xff] }
 0x2ae   : > { %7329 = vmatprep.mubr.msk.f32.mxu1 %vm734_vm4, %v4167_v9 }
 0x2b1   : > { %7330 = vmatmul.mubr.msk.f32.gmra.mrb[12].mxu1 %vm734_vm4, %v4168_v11  ;;  %v4655_v11 = vld [vmem:[#allocation2 + $0x56] sm:$0xff] }
 0x2b2   : > { %7332 = vmatprep.mubr.msk.f32.mxu1 %vm734_vm4, %v4169_v41 }
 0x2b5   : > { %7333 = vmatmul.mubr.msk.f32.gmra.mrb[14].mxu1 %vm734_vm4, %v4170_v45  ;;  %v4656_v45 = vld [vmem:[#allocation2 + $0x5e] sm:$0xff] }
 0x2b6   : > { %7335 = vmatprep.mubr.msk.f32.mxu1 %vm734_vm4, %v4171_v51 }
 0x2b9   : > { %7336 = vmatmul.mubr.msk.f32.gmra.mrb[16].mxu1 %vm734_vm4, %v4172_v55  ;;  %v4657_v55 = vld [vmem:[#allocation2 + $0x66] sm:$0xff] }
 0x2ba   : > { %7338 = vmatprep.mubr.msk.f32.mxu1 %vm734_vm4, %v4173_v61 }
 0x2bd   : > { %7339 = vmatmul.mubr.msk.f32.gmra.mrb[18].mxu1 %vm734_vm4, %v4174_v2  ;;  %v4658_v2 = vld [vmem:[#allocation2 + $0x6e] sm:$0xff] }
 0x2be   : > { %7341 = vmatprep.mubr.msk.f32.mxu1 %vm734_vm4, %v4175_v8 }
 0x2bf   : > { %v9099_v12 = vpop.f32.mrb[84].mxu0 }
 0x2c0   : > { %v9101_v22 = vpop.f32.mrb[85].mxu0 }
 0x2c1   : > { %7342 = vmatmul.mubr.msk.f32.gmra.mrb[20].mxu1 %vm734_vm4, %v4176_v18  ;;  %v4659_v18 = vld [vmem:[#allocation2 + $0x76] sm:$0xff] }
 0x2c2   : > { %7344 = vmatprep.mubr.msk.f32.mxu1 %vm734_vm4, %v4177_v28 }
 0x2c3   : > { %v9105_v32 = vpop.f32.mrb[86].mxu0 }
 0x2c4   : > { %v9107_v48 = vpop.f32.mrb[87].mxu0 }
 0x2c5   : > { %7345 = vmatmul.mubr.msk.f32.gmra.mrb[22].mxu1 %vm734_vm4, %v4178_v43  ;;  %v4660_v43 = vld [vmem:[#allocation2 + $0x7e] sm:$0xff] }
 0x2c6   : > { %7347 = vmatprep.mubr.msk.f32.mxu1 %vm734_vm4, %v4179_v56 }
 0x2c7   : > { %v9111_v60 = vpop.f32.mrb[88].mxu0 }
 0x2c8   : > { %v9113_v10 = vpop.f32.mrb[89].mxu0 }
 0x2c9   : > { %7348 = vmatmul.mubr.msk.f32.gmra.mrb[24].mxu1 %vm734_vm4, %v4180_v5  ;;  %v4661_v5 = vld [vmem:[#allocation2 + $0x86] sm:$0xff] }
 0x2ca   : > { %7350 = vmatprep.mubr.msk.f32.mxu1 %vm734_vm4, %v4181_v17 }
 0x2cb   : > { %v9117_v23 = vpop.f32.mrb[90].mxu0 }
 0x2cc   : > { %v9119_v36 = vpop.f32.mrb[91].mxu0 }
 0x2cd   : > { %7351 = vmatmul.mubr.msk.f32.gmra.mrb[26].mxu1 %vm734_vm4, %v4182_v30  ;;  %v4662_v30 = vld [vmem:[#allocation2 + $0x8e] sm:$0xff] }
 0x2ce   : > { %7353 = vmatprep.mubr.msk.f32.mxu1 %vm734_vm4, %v4183_v46 }
 0x2cf   : > { %v9123_v52 = vpop.f32.mrb[92].mxu0 }
 0x2d0   : > { %v9125_v54 = vpop.f32.mrb[93].mxu0 }
 0x2d1   : > { %7354 = vmatmul.mubr.msk.f32.gmra.mrb[28].mxu1 %vm734_vm4, %v4184_v13  ;;  %v4663_v13 = vld [vmem:[#allocation2 + $0x96] sm:$0xff] }
 0x2d2   : > { %7356 = vmatprep.mubr.msk.f32.mxu1 %vm734_vm4, %v4185_v58 }
 0x2d3   : > { %v9129_v14 = vpop.f32.mrb[94].mxu0 }
 0x2d4   : > { %v9131_v15 = vpop.f32.mrb[95].mxu0 }
 0x2d5   : > { %7357 = vmatmul.mubr.msk.f32.gmra.mrb[30].mxu1 %vm734_vm4, %v4186_v63  ;;  %v4664_v63 = vld [vmem:[#allocation2 + $0x9e] sm:$0xff] }
 0x2d6   : > { %7359 = vmatprep.mubr.msk.f32.mxu1 %vm734_vm4, %v4187_v19 }
 0x2d7   : > { %v9135_v20 = vpop.f32.mrb[96].mxu0 }
 0x2d8   : > { %v9137_v21 = vpop.f32.mrb[97].mxu0 }
 0x2d9   : > { %7360 = vmatmul.mubr.msk.f32.gmra.mrb[32].mxu1 %vm734_vm4, %v4188_v16  ;;  %v4665_v16 = vld [vmem:[#allocation2 + $0xa6] sm:$0xff] }
 0x2da   : > { %7362 = vmatprep.mubr.msk.f32.mxu1 %vm734_vm4, %v4189_v24 }
 0x2db   : > { %v9141_v25 = vpop.f32.mrb[98].mxu0 }
 0x2dc   : > { %v9143_v27 = vpop.f32.mrb[99].mxu0 }
 0x2dd   : > { %7363 = vmatmul.mubr.msk.f32.gmra.mrb[34].mxu1 %vm734_vm4, %v4190_v26  ;;  %v4666_v26 = vld [vmem:[#allocation2 + $0xae] sm:$0xff] }
 0x2de   : > { %7365 = vmatprep.mubr.msk.f32.mxu1 %vm734_vm4, %v4191_v29 }
 0x2df   : > { %v9147_v31 = vpop.f32.mrb[100].mxu0 }
 0x2e0   : > { %v9149_v33 = vpop.f32.mrb[101].mxu0 }
 0x2e1   : > { %7366 = vmatmul.mubr.msk.f32.gmra.mrb[36].mxu1 %vm734_vm4, %v4192_v35 }
 0x2e2   : > { %7368 = vmatprep.mubr.msk.f32.mxu1 %vm734_vm4, %v4193_v6  ;;  %v4667_v6 = vld [vmem:[#allocation2 + $0xb6] sm:$0xff] }
 0x2e3   : > { %v9153_v39 = vpop.f32.mrb[102].mxu0 }
 0x2e4   : > { %v9155_v40 = vpop.f32.mrb[103].mxu0 }
 0x2e5   : > { %7369 = vmatmul.mubr.msk.f32.gmra.mrb[38].mxu1 %vm734_vm4, %v4194_v34  ;;  %v4668_v34 = vld [vmem:[#allocation2 + $0xbe] sm:$0xff] }
 0x2e6   : > { %7371 = vmatprep.mubr.msk.f32.mxu1 %vm734_vm4, %v4195_v37 }
 0x2e7   : > { %v9159_v44 = vpop.f32.mrb[104].mxu0 }
 0x2e8   : > { %v9161_v47 = vpop.f32.mrb[105].mxu0 }
 0x2e9   : > { %7372 = vmatmul.mubr.msk.f32.gmra.mrb[40].mxu1 %vm734_vm4, %v4196_v42  ;;  %v4669_v42 = vld [vmem:[#allocation2 + $0xc6] sm:$0xff] }
 0x2ea   : > { %7390 = vmatprep.mubr.msk.f32.mxu1 %vm734_vm4, %v4649_v38  ;;  %v4670_v38 = vld [vmem:[#allocation2 + $0xce] sm:$0xff] }
 0x2eb   : > { %v9165_v49 = vpop.f32.mrb[106].mxu0 }
 0x2ec   : > { %v9167_v53 = vpop.f32.mrb[107].mxu0 }
 0x2ed   : > { %7391 = vmatmul.mubr.msk.f32.vlgmr.msra.gmra.mrb[0].mxu1 %vm734_vm4, %v4650_v50  ;;  %v4671_v50 = vld [vmem:[#allocation2 + $0xd6] sm:$0xff] }
 0x2ee   : > { %7393 = vmatprep.mubr.msk.f32.mxu1 %vm734_vm4, %v4651_v57  ;;  %v4672_v57 = vld [vmem:[#allocation2 + $0xde] sm:$0xff] }
 0x2ef   : > { %v9171_v59 = vpop.f32.mrb[108].mxu0 }
 0x2f0   : > { %v9173_v0 = vpop.f32.mrb[109].mxu0 }
 0x2f1   : > { %7394 = vmatmul.mubr.msk.f32.gmra.mrb[2].mxu1 %vm734_vm4, %v4652_v62  ;;  %v4673_v62 = vld [vmem:[#allocation2 + $0xe6] sm:$0xff] }
 0x2f2   : > { %7396 = vmatprep.mubr.msk.f32.mxu1 %vm734_vm4, %v4653_v3  ;;  %v4674_v3 = vld [vmem:[#allocation2 + $0xee] sm:$0xff] }
 0x2f3   : > { %v9177_v4 = vpop.f32.mrb[110].mxu0 }
 0x2f4   : > { %v9179_v9 = vpop.f32.mrb[111].mxu0 }
 0x2f5   : > { %7397 = vmatmul.mubr.msk.f32.gmra.mrb[4].mxu1 %vm734_vm4, %v4654_v7  ;;  %v4675_v7 = vld [vmem:[#allocation2 + $0xf6] sm:$0xff] }
 0x2f6   : > { %7399 = vmatprep.mubr.msk.f32.mxu1 %vm734_vm4, %v4655_v11  ;;  %v4676_v11 = vld [vmem:[#allocation2 + $0xfe] sm:$0xff] }
 0x2f7   : > { %v9183_v41 = vpop.f32.mrb[112].mxu0 }
 0x2f8   : > { %v9185_v51 = vpop.f32.mrb[113].mxu0 }
 0x2f9   : > { %7400 = vmatmul.mubr.msk.f32.gmra.mrb[6].mxu1 %vm734_vm4, %v4656_v45  ;;  %v4677_v45 = vld [vmem:[#allocation2 + $0x106] sm:$0xff] }
 0x2fa   : > { %7402 = vmatprep.mubr.msk.f32.mxu1 %vm734_vm4, %v4657_v55  ;;  %v4678_v55 = vld [vmem:[#allocation2 + $0x10e] sm:$0xff] }
 0x2fb   : > { %v9189_v61 = vpop.f32.mrb[114].mxu0 }
 0x2fc   : > { %v9191_v8 = vpop.f32.mrb[115].mxu0 }
 0x2fd   : > { %7403 = vmatmul.mubr.msk.f32.gmra.mrb[8].mxu1 %vm734_vm4, %v4658_v2  ;;  %v4679_v2 = vld [vmem:[#allocation2 + $0x116] sm:$0xff] }
 0x2fe   : > { %7405 = vmatprep.mubr.msk.f32.mxu1 %vm734_vm4, %v4659_v18  ;;  %v4680_v18 = vld [vmem:[#allocation2 + $0x11e] sm:$0xff] }
 0x2ff   : > { %v9195_v28 = vpop.f32.mrb[116].mxu0 }
 0x300   : > { %v9197_v56 = vpop.f32.mrb[117].mxu0 }
 0x301   : > { %7406 = vmatmul.mubr.msk.f32.gmra.mrb[10].mxu1 %vm734_vm4, %v4660_v43  ;;  %v4681_v43 = vld [vmem:[#allocation2 + $0x126] sm:$0xff] }
 0x302   : > { %7408 = vmatprep.mubr.msk.f32.mxu1 %vm734_vm4, %v4661_v5  ;;  %v4682_v5 = vld [vmem:[#allocation2 + $0x12e] sm:$0xff] }
 0x303   : > { %v9201_v17 = vpop.f32.mrb[118].mxu0 }
 0x304   : > { %v9203_v46 = vpop.f32.mrb[119].mxu0 }
 0x305   : > { %7409 = vmatmul.mubr.msk.f32.gmra.mrb[12].mxu1 %vm734_vm4, %v4662_v30  ;;  %v4683_v30 = vld [vmem:[#allocation2 + $0x136] sm:$0xff] }
 0x306   : > { %7411 = vmatprep.mubr.msk.f32.mxu1 %vm734_vm4, %v4663_v13  ;;  %v4684_v13 = vld [vmem:[#allocation2 + $0x13e] sm:$0xff] }
 0x307   : > { %v9207_v58 = vpop.f32.mrb[120].mxu0 }
 0x308   : > { %v9209_v19 = vpop.f32.mrb[121].mxu0 }
 0x309   : > { %7412 = vmatmul.mubr.msk.f32.gmra.mrb[14].mxu1 %vm734_vm4, %v4664_v63  ;;  %v4685_v63 = vld [vmem:[#allocation2 + $0x146] sm:$0xff] }
 0x30a   : > { %7414 = vmatprep.mubr.msk.f32.mxu1 %vm734_vm4, %v4665_v16  ;;  %v4687_v16 = vld [vmem:[#allocation2 + $0x156] sm:$0xff] }
 0x30b   : > { %v9213_v24 = vpop.f32.mrb[122].mxu0 }
 0x30c   : > { %v9215_v29 = vpop.f32.mrb[123].mxu0 }
 0x30d   : > { %7415 = vmatmul.mubr.msk.f32.gmra.mrb[16].mxu1 %vm734_vm4, %v4666_v26  ;;  %v4686_v26 = vld [vmem:[#allocation2 + $0x14e] sm:$0xff] }
 0x30e   : > { %7417 = vmatprep.mubr.msk.f32.mxu1 %vm734_vm4, %v4667_v6  ;;  %v4688_v6 = vld [vmem:[#allocation2 + $0x15e] sm:$0xff] }
 0x30f   : > { %v9219_v35 = vpop.f32.mrb[124].mxu0 }
 0x310   : > { %v9221_v37 = vpop.f32.mrb[125].mxu0 }
 0x311   : > { %7418 = vmatmul.mubr.msk.f32.gmra.mrb[18].mxu1 %vm734_vm4, %v4668_v34  ;;  %v4689_v34 = vld [vmem:[#allocation2 + $0x166] sm:$0xff] }
 0x312   : > { %7420 = vmatprep.mubr.msk.f32.mxu1 %vm734_vm4, %v4669_v42  ;;  %v4690_v42 = vld [vmem:[#allocation2 + $0x16e] sm:$0xff] }
 0x315   : > { %7421 = vmatmul.mubr.msk.f32.gmra.mrb[20].mxu1 %vm734_vm4, %v4670_v38  ;;  %v9249_v38 = vld [vmem:[%s9434_s4] sm:$0xff] }
 0x316   : > { %7423 = vmatprep.mubr.msk.f32.mxu1 %vm734_vm4, %v4671_v50  ;;  %6639 = vmatprep.mubr.msk.f32.mxu0 %vm5241_vm5, %v9249_v38 }
 0x319   : > { %7424 = vmatmul.mubr.msk.f32.gmra.mrb[22].mxu1 %vm734_vm4, %v4672_v57  ;;  %v9256_v57 = vld [vmem:[%s9433_s3] ss:$0 sm:$0xff] }
 0x31a   : > { %7426 = vmatprep.mubr.msk.f32.mxu1 %vm734_vm4, %v4673_v62 }
 0x31d   : > { %7427 = vmatmul.mubr.msk.f32.gmra.mrb[24].mxu1 %vm734_vm4, %v4674_v3 }
 0x31e   : > { %7429 = vmatprep.mubr.msk.f32.mxu1 %vm734_vm4, %v4675_v7 }
 0x321   : > { %7430 = vmatmul.mubr.msk.f32.gmra.mrb[26].mxu1 %vm734_vm4, %v4676_v11 }
 0x322   : > { %7432 = vmatprep.mubr.msk.f32.mxu1 %vm734_vm4, %v4677_v45 }
 0x325   : > { %7433 = vmatmul.mubr.msk.f32.gmra.mrb[28].mxu1 %vm734_vm4, %v4678_v55 }
 0x326   : > { %7435 = vmatprep.mubr.msk.f32.mxu1 %vm734_vm4, %v4679_v2 }
 0x329   : > { %7436 = vmatmul.mubr.msk.f32.gmra.mrb[30].mxu1 %vm734_vm4, %v4680_v18 }
 0x32a   : > { %7438 = vmatprep.mubr.msk.f32.mxu1 %vm734_vm4, %v4681_v43 }
 0x32d   : > { %7439 = vmatmul.mubr.msk.f32.gmra.mrb[32].mxu1 %vm734_vm4, %v4682_v5 }
 0x32e   : > { %7441 = vmatprep.mubr.msk.f32.mxu1 %vm734_vm4, %v4683_v30 }
 0x331   : > { %7442 = vmatmul.mubr.msk.f32.gmra.mrb[34].mxu1 %vm734_vm4, %v4684_v13 }
 0x332   : > { %7444 = vmatprep.mubr.msk.f32.mxu1 %vm734_vm4, %v4685_v63 }
 0x335   : > { %7445 = vmatmul.mubr.msk.f32.gmra.mrb[36].mxu1 %vm734_vm4, %v4686_v26 }
 0x336   : > { %7447 = vmatprep.mubr.msk.f32.mxu1 %vm734_vm4, %v4687_v16 }
 0x339   : > { %7448 = vmatmul.mubr.msk.f32.gmra.mrb[38].mxu1 %vm734_vm4, %v4688_v6 }
 0x33a   : > { %7450 = vmatprep.mubr.msk.f32.mxu1 %vm734_vm4, %v4689_v34 }
 0x33d   : > { %7451 = vmatmul.mubr.msk.f32.gmra.mrb[40].mxu1 %vm734_vm4, %v4690_v42 }
 0x3c0   : > { %v7392_v50 = vpop.f32.mrb[0].mxu1 }
 0x3c1   : > { %v7688_v62 = vadd.f32 %v7392_v50, %v9099_v12  ;;  %v4892_v3 = vpop.f32.mrb[1].mxu1 }
 0x3c2   : > { %v7689_v7 = vadd.f32 %v4892_v3, %v9101_v22 }
 0x3c3   : > { %v5151_v11 = vadd.f32 %v7688_v62, %v9256_v57 }
 0x3c4   : > { %v5150_v45 = vadd.f32 %v7689_v7, %v9256_v57  ;;  %v7395_v55 = vpop.f32.mrb[2].mxu1 }
 0x3c5   : > { %v5193_v2 = vmax.f32 %v5151_v11, 0.0  ;;  %v7690_v18 = vadd.f32 %v7395_v55, %v9105_v32  ;;  %v4902_v43 = vpop.f32.mrb[3].mxu1 }
 0x3c6   : > { %v5192_v5 = vmax.f32 %v5150_v45, 0.0  ;;  %v7691_v30 = vadd.f32 %v4902_v43, %v9107_v48 }
 0x3c7   : > { %v5153_v13 = vadd.f32 %v7690_v18, %v9256_v57 }
 0x3c8   : > { %v9265_v63 = vpack.c.bf16 %v5193_v2, %v5192_v5  ;;  %v5152_v12 = vadd.f32 %v7691_v30, %v9256_v57  ;;  %v7398_v16 = vpop.f32.mrb[4].mxu1 }
 0x3c9   : > { %v5195_v22 = vmax.f32 %v5153_v13, 0.0  ;;  %v7692_v26 = vadd.f32 %v7398_v16, %v9111_v60  ;;  %v4912_v6 = vpop.f32.mrb[5].mxu1  ;;  %v8087_v16 = vmov 0  }
 0x3ca   : > { %v5194_v34 = vmax.f32 %v5152_v12, 0.0  ;;  %v7693_v42 = vadd.f32 %v4912_v6, %v9113_v10  ;;  %8039 = vset.pattern.permute.xlu0 %v8087_v16 }
 0x3cb   : > { %v5155_v32 = vadd.f32 %v7692_v26, %v9256_v57 }
 0x3cc   : > { %v9271_v50 = vpack.c.bf16 %v5195_v22, %v5194_v34  ;;  %v5154_v48 = vadd.f32 %v7693_v42, %v9256_v57  ;;  %v7401_v62 = vpop.f32.mrb[6].mxu1 }
 0x3cd   : > { %v5197_v3 = vmax.f32 %v5155_v32, 0.0  ;;  %v7694_v7 = vadd.f32 %v7401_v62, %v9117_v23  ;;  %v4922_v11 = vpop.f32.mrb[7].mxu1  ;;  %v5235_v23 = vld [vmem:[%s9435_s5] sm:$0xff] }
 0x3ce   : > { %v5196_v45 = vmax.f32 %v5154_v48, 0.0  ;;  %v7695_v55 = vadd.f32 %v4922_v11, %v9119_v36  ;;  %5238 = vperm.xlu0 %8039, %v5235_v23  }
 0x3cf   : > { %v5157_v60 = vadd.f32 %v7694_v7, %v9256_v57 }
 0x3d0   : > { %v9277_v2 = vpack.c.bf16 %v5197_v3, %v5196_v45  ;;  %v5156_v10 = vadd.f32 %v7695_v55, %v9256_v57  ;;  %v7404_v18 = vpop.f32.mrb[8].mxu1 }
 0x3d1   : > { %v5199_v43 = vmax.f32 %v5157_v60, 0.0  ;;  %v7696_v5 = vadd.f32 %v7404_v18, %v9123_v52  ;;  %v4932_v30 = vpop.f32.mrb[9].mxu1 }
 0x3d2   : > { %v5198_v13 = vmax.f32 %v5156_v10, 0.0  ;;  %v7697_v12 = vadd.f32 %v4932_v30, %v9125_v54 }
 0x3d3   : > { %v5159_v36 = vadd.f32 %v7696_v5, %v9256_v57 }
 0x3d4   : > { %v9286_v22 = vpack.c.bf16 %v5199_v43, %v5198_v13  ;;  %v5158_v26 = vadd.f32 %v7697_v12, %v9256_v57  ;;  %v7407_v6 = vpop.f32.mrb[10].mxu1 }
 0x3d5   : > { %v5201_v34 = vmax.f32 %v5159_v36, 0.0  ;;  %v7698_v52 = vadd.f32 %v7407_v6, %v9129_v14  ;;  %v4942_v42 = vpop.f32.mrb[11].mxu1 }
 0x3d6   : > { %v5200_v32 = vmax.f32 %v5158_v26, 0.0  ;;  %v7699_v54 = vadd.f32 %v4942_v42, %v9131_v15 }
 0x3d7   : > { %v5161_v48 = vadd.f32 %v7698_v52, %v9256_v57 }
 0x3d8   : > { %v9292_v62 = vpack.c.bf16 %v5201_v34, %v5200_v32  ;;  %v5160_v3 = vadd.f32 %v7699_v54, %v9256_v57  ;;  %v7410_v7 = vpop.f32.mrb[12].mxu1 }
 0x3d9   : > { %v5203_v11 = vmax.f32 %v5161_v48, 0.0  ;;  %v7700_v45 = vadd.f32 %v7410_v7, %v9135_v20  ;;  %v4952_v55 = vpop.f32.mrb[13].mxu1 }
 0x3da   : > { %v5202_v60 = vmax.f32 %v5160_v3, 0.0  ;;  %v7701_v10 = vadd.f32 %v4952_v55, %v9137_v21 }
 0x3db   : > { %v5163_v14 = vadd.f32 %v7700_v45, %v9256_v57 }
 0x3dc   : > { %v9298_v18 = vpack.c.bf16 %v5203_v11, %v5202_v60  ;;  %v5162_v15 = vadd.f32 %v7701_v10, %v9256_v57  ;;  %v7413_v43 = vpop.f32.mrb[14].mxu1 }
 0x3dd   : > { %v5205_v5 = vmax.f32 %v5163_v14, 0.0  ;;  %v7702_v30 = vadd.f32 %v7413_v43, %v9141_v25  ;;  %v4962_v13 = vpop.f32.mrb[15].mxu1 }
 0x3de   : > { %v5204_v12 = vmax.f32 %v5162_v15, 0.0  ;;  %v7703_v23 = vadd.f32 %v4962_v13, %v9143_v27 }
 0x3df   : > { %v5165_v20 = vadd.f32 %v7702_v30, %v9256_v57 }
 0x3e0   : > { %v9304_v36 = vpack.c.bf16 %v5205_v5, %v5204_v12  ;;  %v5164_v21 = vadd.f32 %v7703_v23, %v9256_v57  ;;  %v7416_v16 = vpop.f32.mrb[16].mxu1 }
 0x3e1   : > { %v5207_v26 = vmax.f32 %v5165_v20, 0.0  ;;  %v7704_v6 = vadd.f32 %v7416_v16, %v9147_v31  ;;  %v4972_v34 = vpop.f32.mrb[17].mxu1 }
 0x3e2   : > { %v5206_v52 = vmax.f32 %v5164_v21, 0.0  ;;  %v7705_v42 = vadd.f32 %v4972_v34, %v9149_v33 }
 0x3e3   : > { %v5167_v25 = vadd.f32 %v7704_v6, %v9256_v57 }
 0x3e4   : > { %v9310_v32 = vpack.c.bf16 %v5207_v26, %v5206_v52  ;;  %v5166_v27 = vadd.f32 %v7705_v42, %v9256_v57  ;;  %v7419_v54 = vpop.f32.mrb[18].mxu1 }
 0x3e5   : > { %v5209_v48 = vmax.f32 %v5167_v25, 0.0  ;;  %v7706_v3 = vadd.f32 %v7419_v54, %v9153_v39  ;;  %v4982_v7 = vpop.f32.mrb[19].mxu1 }
 0x3e6   : > { %v5208_v11 = vmax.f32 %v5166_v27, 0.0  ;;  %v7707_v45 = vadd.f32 %v4982_v7, %v9155_v40 }
 0x3e7   : > { %v5169_v31 = vadd.f32 %v7706_v3, %v9256_v57 }
 0x3e8   : > { %v7620_v55 = vpack.c.bf16 %v5209_v48, %v5208_v11  ;;  %v5168_v60 = vadd.f32 %v7707_v45, %v9256_v57  ;;  %v7422_v10 = vpop.f32.mrb[20].mxu1 }
 0x3e9   : > { %v5211_v14 = vmax.f32 %v5169_v31, 0.0  ;;  %v7708_v15 = vadd.f32 %v7422_v10, %v9159_v44  ;;  %v4992_v39 = vpop.f32.mrb[21].mxu1 }
 0x3ea   : > { %v5210_v43 = vmax.f32 %v5168_v60, 0.0  ;;  %v7709_v5 = vadd.f32 %v4992_v39, %v9161_v47  ;;  %7622 = vmatprep.subr.msk.bf16.mxu0 %vm9318_vm6, %v7620_v55 }
 0x3eb   : > { %v5171_v40 = vadd.f32 %v7708_v15, %v9256_v57  ;;  %7625 = vmatpush3.bf16.xpose.msk.msra.mxu0 %vm9318_vm6, %v9265_v63 }
 0x3ec   : > { %v7626_v30 = vpack.c.bf16 %v5211_v14, %v5210_v43  ;;  %v5170_v13 = vadd.f32 %v7709_v5, %v9256_v57  ;;  %v7425_v12 = vpop.f32.mrb[22].mxu1 }
 0x3ed   : > { %v5213_v23 = vmax.f32 %v5171_v40, 0.0  ;;  %v7710_v44 = vadd.f32 %v7425_v12, %v9165_v49  ;;  %v5002_v20 = vpop.f32.mrb[23].mxu1 }
 0x3ee   : > { %v5212_v21 = vmax.f32 %v5170_v13, 0.0  ;;  %v7711_v47 = vadd.f32 %v5002_v20, %v9167_v53  ;;  %7628 = vmatprep.subr.msk.bf16.mxu0 %vm9318_vm6, %v7626_v30 }
 0x3ef   : > { %v5173_v16 = vadd.f32 %v7710_v44, %v9256_v57 }
 0x3f0   : > { %v7632_v26 = vpack.c.bf16 %v5213_v23, %v5212_v21  ;;  %v5172_v6 = vadd.f32 %v7711_v47, %v9256_v57  ;;  %v7428_v63 = vpop.f32.mrb[24].mxu1 }
 0x3f1   : > { %v5215_v34 = vmax.f32 %v5173_v16, 0.0  ;;  %v7712_v52 = vadd.f32 %v7428_v63, %v9171_v59  ;;  %v5012_v42 = vpop.f32.mrb[25].mxu1 }
 0x3f2   : > { %v5214_v25 = vmax.f32 %v5172_v6, 0.0  ;;  %v7713_v49 = vadd.f32 %v5012_v42, %v9173_v0 }
 0x3f3   : > { %v5175_v27 = vadd.f32 %v7712_v52, %v9256_v57  ;;  %7631 = vmatpush3.bf16.xpose.msk.msra.mxu0 %vm9318_vm6, %v9271_v50 }
 0x3f4   : > { %v7638_v53 = vpack.c.bf16 %v5215_v34, %v5214_v25  ;;  %v5174_v54 = vadd.f32 %v7713_v49, %v9256_v57  ;;  %v7431_v48 = vpop.f32.mrb[26].mxu1  ;;  %7634 = vmatprep.subr.msk.bf16.mxu0 %vm9318_vm6, %v7632_v26 }
 0x3f5   : > { %v5217_v3 = vmax.f32 %v5175_v27, 0.0  ;;  %v7714_v59 = vadd.f32 %v7431_v48, %v9177_v4  ;;  %v5022_v7 = vpop.f32.mrb[27].mxu1 }
 0x3f6   : > { %v5216_v11 = vmax.f32 %v5174_v54, 0.0  ;;  %v7715_v0 = vadd.f32 %v5022_v7, %v9179_v9 }
 0x3f7   : > { %v5177_v45 = vadd.f32 %v7714_v59, %v9256_v57 }
 0x3f8   : > { %v7644_v31 = vpack.c.bf16 %v5217_v3, %v5216_v11  ;;  %v5176_v55 = vadd.f32 %v7715_v0, %v9256_v57  ;;  %v7434_v50 = vpop.f32.mrb[28].mxu1 }
 0x3f9   : > { %v5219_v60 = vmax.f32 %v5177_v45, 0.0  ;;  %v7716_v10 = vadd.f32 %v7434_v50, %v9183_v41  ;;  %v5032_v14 = vpop.f32.mrb[29].mxu1 }
 0x3fa   : > { %v5218_v15 = vmax.f32 %v5176_v55, 0.0  ;;  %v7717_v39 = vadd.f32 %v5032_v14, %v9185_v51 }
 0x3fb   : > { %v5179_v43 = vadd.f32 %v7716_v10, %v9256_v57  ;;  %7637 = vmatpush3.bf16.xpose.msk.msra.mxu0 %vm9318_vm6, %v9277_v2 }
 0x3fc   : > { %v7650_v4 = vpack.c.bf16 %v5219_v60, %v5218_v15  ;;  %v5178_v9 = vadd.f32 %v7717_v39, %v9256_v57  ;;  %v7437_v5 = vpop.f32.mrb[30].mxu1  ;;  %7640 = vmatprep.subr.msk.bf16.mxu0 %vm9318_vm6, %v7638_v53 }
 0x3fd   : > { %v5221_v40 = vmax.f32 %v5179_v43, 0.0  ;;  %v7718_v41 = vadd.f32 %v7437_v5, %v9189_v61  ;;  %v5042_v30 = vpop.f32.mrb[31].mxu1 }
 0x3fe   : > { %v5220_v13 = vmax.f32 %v5178_v9, 0.0  ;;  %v7719_v51 = vadd.f32 %v5042_v30, %v9191_v8 }
 0x3ff   : > { %v5181_v12 = vadd.f32 %v7718_v41, %v9256_v57 }
 0x400   : > { %v7656_v23 = vpack.c.bf16 %v5221_v40, %v5220_v13  ;;  %v5180_v44 = vadd.f32 %v7719_v51, %v9256_v57  ;;  %v7440_v2 = vpop.f32.mrb[32].mxu1 }
 0x401   : > { %v5223_v20 = vmax.f32 %v5181_v12, 0.0  ;;  %v7720_v21 = vadd.f32 %v7440_v2, %v9195_v28  ;;  %v5052_v47 = vpop.f32.mrb[33].mxu1 }
 0x402   : > { %v5222_v16 = vmax.f32 %v5180_v44, 0.0  ;;  %v7721_v26 = vadd.f32 %v5052_v47, %v9197_v56 }
 0x403   : > { %v5183_v6 = vadd.f32 %v7720_v21, %v9256_v57  ;;  %7643 = vmatpush3.bf16.xpose.msk.msra.mxu0 %vm9318_vm6, %v9286_v22 }
 0x404   : > { %v7662_v61 = vpack.c.bf16 %v5223_v20, %v5222_v16  ;;  %v5182_v8 = vadd.f32 %v7721_v26, %v9256_v57  ;;  %v7443_v63 = vpop.f32.mrb[34].mxu1  ;;  %7646 = vmatprep.subr.msk.bf16.mxu0 %vm9318_vm6, %v7644_v31 }
 0x405   : > { %v5225_v34 = vmax.f32 %v5183_v6, 0.0  ;;  %v7722_v28 = vadd.f32 %v7443_v63, %v9201_v17  ;;  %v5062_v52 = vpop.f32.mrb[35].mxu1 }
 0x406   : > { %v5224_v42 = vmax.f32 %v5182_v8, 0.0  ;;  %v7723_v56 = vadd.f32 %v5062_v52, %v9203_v46 }
 0x407   : > { %v5185_v25 = vadd.f32 %v7722_v28, %v9256_v57 }
 0x408   : > { %v7669_v49 = vpack.c.bf16 %v5225_v34, %v5224_v42  ;;  %v5184_v27 = vadd.f32 %v7723_v56, %v9256_v57  ;;  %v7446_v22 = vpop.f32.mrb[36].mxu1 }
 0x409   : > { %v5227_v53 = vmax.f32 %v5185_v25, 0.0  ;;  %v7724_v54 = vadd.f32 %v7446_v22, %v9207_v58  ;;  %v5072_v48 = vpop.f32.mrb[37].mxu1 }
 0x40a   : > { %v5226_v3 = vmax.f32 %v5184_v27, 0.0  ;;  %v7725_v59 = vadd.f32 %v5072_v48, %v9209_v19 }
 0x40b   : > { %v5187_v7 = vadd.f32 %v7724_v54, %v9256_v57  ;;  %7649 = vmatpush3.bf16.xpose.msk.msra.mxu0 %vm9318_vm6, %v9292_v62 }
 0x40c   : > { %v7673_v17 = vpack.c.bf16 %v5227_v53, %v5226_v3  ;;  %v5186_v46 = vadd.f32 %v7725_v59, %v9256_v57  ;;  %v7449_v11 = vpop.f32.mrb[38].mxu1  ;;  %7652 = vmatprep.subr.msk.bf16.mxu0 %vm9318_vm6, %v7650_v4 }
 0x40d   : > { %v5229_v0 = vmax.f32 %v5187_v7, 0.0  ;;  %v7726_v58 = vadd.f32 %v7449_v11, %v9213_v24  ;;  %v5082_v45 = vpop.f32.mrb[39].mxu1 }
 0x40e   : > { %v5228_v31 = vmax.f32 %v5186_v46, 0.0  ;;  %v7727_v19 = vadd.f32 %v5082_v45, %v9215_v29 }
 0x40f   : > { %v5189_v55 = vadd.f32 %v7726_v58, %v9256_v57 }
 0x410   : > { %v7677_v50 = vpack.c.bf16 %v5229_v0, %v5228_v31  ;;  %v5188_v60 = vadd.f32 %v7727_v19, %v9256_v57  ;;  %v7452_v62 = vpop.f32.mrb[40].mxu1 }
 0x411   : > { %v5231_v10 = vmax.f32 %v5189_v55, 0.0  ;;  %v7728_v14 = vadd.f32 %v7452_v62, %v9219_v35  ;;  %v5092_v15 = vpop.f32.mrb[41].mxu1  ;;  %v8088_v35 = vmov 0.0|0.0  }
 0x412   : > { %v5230_v39 = vmax.f32 %v5188_v60, 0.0  ;;  %v7729_v43 = vadd.f32 %v5092_v15, %v9221_v37 }
 0x413   : > { %v5191_v4 = vadd.f32 %v7728_v14, %v9256_v57  ;;  %7655 = vmatpush3.bf16.xpose.msk.msra.mxu0 %vm9318_vm6, %v9298_v18 }
 0x414   : > { %v7681_v24 = vpack.c.bf16 %v5231_v10, %v5230_v39  ;;  %v5190_v29 = vadd.f32 %v7729_v43, %v9256_v57  ;;  %7658 = vmatprep.subr.msk.bf16.mxu0 %vm9318_vm6, %v7656_v23 }
 0x415   : > { %v5233_v9 = vmax.f32 %v5191_v4, 0.0 }
 0x416   : > { %v5232_v5 = vmax.f32 %v5190_v29, 0.0 }
 0x418   : > { %v7685_v40 = vpack.c.bf16 %v5233_v9, %v5232_v5 }
 0x41b   : > { %7661 = vmatpush3.bf16.xpose.msk.msra.mxu0 %vm9318_vm6, %v9304_v36 }
 0x41c   : > { %7664 = vmatprep.subr.msk.bf16.mxu0 %vm9318_vm6, %v7662_v61 }
 0x423   : > { %7667 = vmatpush3.bf16.xpose.msk.msra.mxu0 %vm9318_vm6, %v9310_v32 }
 0x424   : > { %7668 = vmatprep.subr.bf16.mxu0 %v8088_v35 }
 0x42a   : > { %6640 = vmatmul.mubr.msk.f32.vlgmr.msra.gmra.mrb[126].mxu0 %vm5241_vm5, %v9249_v38 }
 0x42b   : > { %7671 = vmatpush3.bf16.xpose.msk.msra.mxu0 %vm9318_vm6, %v7669_v49  ;;  %7473 = vmatprep.mubr.msk.f32.mxu0 %vm8086_vm2, %v8084_v1 }
 0x42c   : > { %7672 = vmatprep.subr.bf16.mxu0 %v8088_v35 }
 0x433   : > { %7675 = vmatpush3.bf16.xpose.msk.msra.mxu0 %vm9318_vm6, %v7673_v17 }
 0x434   : > { %7676 = vmatprep.subr.bf16.mxu0 %v8088_v35 }
 0x43b   : > { %7679 = vmatpush3.bf16.xpose.msk.msra.mxu0 %vm9318_vm6, %v7677_v50 }
 0x43c   : > { %7680 = vmatprep.subr.bf16.mxu0 %v8088_v35 }
 0x443   : > { %7683 = vmatpush3.bf16.xpose.msk.msra.mxu0 %vm9318_vm6, %v7681_v24 }
 0x444   : > { %7684 = vmatprep.subr.bf16.mxu0 %v8088_v35 }
 0x44b   : > { %7687 = vmatpush3.bf16.xpose.msk.msra.mxu0 %vm9318_vm6, %v7685_v40 }
 0x44d   : > { %v5239_v1 = vpop.permute.xlu0 %5238 }
 0x452   : > { %7474 = vmatmul.mubr.msk.f32.vlgmr.msra.gmra.mrb[128].mxu0 %vm5241_vm5, %v9249_v38 }
 0x4fd   : > { %v5437_v37 = vpop.f32.mrb[126].mxu0 }
 0x4fe   : > { %v5438_v57 = vadd.f32 %v5437_v37, %v5239_v1  ;;  %v5439_v18 = vpop.f32.mrb[127].mxu0 }
 0x4ff   : > { %v5440_v36 = vadd.f32 %v5439_v18, %v5239_v1 }
 0x500   : > { %v6128_v32 = vmul.f32 -1.442695, %v5438_v57 }
 0x501   : > { %v6129_v41 = vmul.f32 -1.442695, %v5440_v36 }
 0x502   : > { %8064 = vpow2.f32 %v6128_v32 }
 0x503   : > { %8066 = vpow2.f32 %v6129_v41 }
 0x50c   : > { %v8065_v30 = vpop.eup %8064 }
 0x50d   : > { %v8067_v13 = vpop.eup %8066  ;;  %v5521_v51 = vadd.f32 1.0, %v8065_v30 }
 0x50e   : > { %v5522_v12 = vadd.f32 1.0, %v8067_v13 }
 0x50f   : > { %8068 = vrcp.f32 %v5521_v51 }
 0x510   : > { %8070 = vrcp.f32 %v5522_v12 }
 0x519   : > { %v8069_v38 = vpop.eup %8068 }
 0x51a   : > { %v8071_v33 = vpop.eup %8070  ;;  %5530 = vst [vmem:[%s251_s9] sm:$0xff] %v8069_v38 }
 0x51b   : > { %5531 = vst [vmem:[%s251_s9 + $0x8] sm:$0xff] %v8071_v33 }
 0x525   : > { %v5508_v23 = vpop.f32.mrb[128].mxu0 }
 0x526   : > { %v5509_v44 = vadd.f32 %v5508_v23, %v5239_v1  ;;  %v7475_v2 = vpop.f32.mrb[129].mxu0 }
 0x528   : > { %v6130_v20 = vmul.f32 -1.442695, %v5509_v44 }
 0x52a   : > { %8072 = vpow2.f32 %v6130_v20 }
 0x534   : > { %v8073_v21 = vpop.eup %8072 }
 0x535   : > { %v5523_v47 = vadd.f32 1.0, %v8073_v21 }
 0x537   : > { %8074 = vrcp.f32 %v5523_v47 }
 0x541   : > { %v8075_v16 = vpop.eup %8074 }
 0x542   : > { %5533 = vst.msk [vmem:[%s251_s9 + $0x10] sm:$0xff] %vm5532_vm7, %v8075_v16 }
 0x543 PF: > { %s16_s21 = sadd.s32 1, %s8082_s21  }
 0x544   : > { %p13_p4 = scmp.ge.s32.totalorder %s16_s21, 4  }
 0x546   :  { %15 = sbr.rel (!%p13_p4) target bundleno = 1 (0x1), region = 82 }

</bundles_post_ra>
